<compile_context>
chip_gen: v6e
topology: v6e:2x2x1
jax: 0.10.0
libtpu: 0.0.40
codegen_flags: <defaults>
</compile_context>

<pallas_src>
import jax
import jax.numpy as jnp
from jax.experimental import pallas as pl
from jax.experimental.pallas import tpu as pltpu

K = 7          # Conv2d kernel size
PAD = 3        # ReflectionPad2d(3)
HALO = 8       # rows fetched from the next row-tile (>= K-1 = 6, multiple of 8)
BN_EPS = 1e-5


def _round_up(x, m):
    return ((x + m - 1) // m) * m


def _pick_tile_rows(ho, wop, n):
    """Rows per tile: multiple of 8, ~2K-8K lanes per tile, prefer an exact divisor of Ho,
    and make sure the (N, row_tiles) grid has >= 2 steps when possible (v7x: 2 TCs)."""
    cap = max(8, (8192 // wop) // 8 * 8)
    ho8 = _round_up(max(ho, 8), 8)
    th = max(8, min(cap, ho8))
    for cand in range(th, 7, -8):          # prefer Ho % TH == 0 (no row mask / row padding)
        if ho % cand == 0:
            th = cand
            break
    if n * ((ho + th - 1) // th) < 2:      # give both v7x TensorCores work if we can
        half = max(8, (th // 2) // 8 * 8)
        if (ho + half - 1) // half >= 2:
            th = half
    return th


def _vmem_limit_bytes():
    """Generation-aware VMEM limit: half of physical, floored at 32 MiB (safe on v7x)."""
    try:
        cap = int(pltpu.get_tpu_info().vmem_capacity_bytes)
    except Exception:
        cap = 64 * 1024 * 1024
    return max(32 * 1024 * 1024, min(96 * 1024 * 1024, cap // 2))


def _emit_rhs(body_ref, halo_ref, rhs_ref, *, kcip, th, wop):
    """Finish im2col in VMEM: for each kernel row kh, copy the kh-shifted row window of the
    kw-expanded input into the (K*kcip, th*wop) scratch.  All slices are static and
    128-lane / 8-sublane aligned (kcip % 8 == 0, wop % 128 == 0)."""
    for kh in range(K):
        r0, r1 = kh * kcip, (kh + 1) * kcip
        if kh == 0:
            rhs_ref[r0:r1, :] = body_ref[0]
        else:
            split = (th - kh) * wop
            rhs_ref[r0:r1, :split] = body_ref[0, :, kh * wop:]
            rhs_ref[r0:r1, split:] = halo_ref[0, :, :kh * wop]


def _make_stats_kernel(*, kcip, th, wop, ho, need_row_mask):
    """Pass 1: in-kernel patch extraction + one deep MXU matmul; emit only per-tile BN sums."""
    def kernel(body_ref, halo_ref, w_ref, sum_ref, sq_ref, rhs_ref):
        _emit_rhs(body_ref, halo_ref, rhs_ref, kcip=kcip, th=th, wop=wop)
        acc = jnp.dot(w_ref[...], rhs_ref[...], preferred_element_type=jnp.float32)
        if need_row_mask:
            # padded rows (>= Ho) in the last row-tile must not pollute the BN statistics;
            # padded *columns* are exact zeros by construction and contribute nothing.
            r = pl.program_id(1)
            lane = jax.lax.broadcasted_iota(jnp.int32, (1, th * wop), 1)
            acc = jnp.where((lane // wop) < (ho - r * th), acc, 0.0)
        sum_ref[0, 0] = jnp.sum(acc, axis=1, keepdims=True)          # (Co, 1)
        sq_ref[0, 0] = jnp.sum(acc * acc, axis=1, keepdims=True)     # (Co, 1)
    return kernel


def _make_apply_kernel(*, kcip, th, wop):
    """Pass 2: recompute the conv tile (no HBM round-trip), fuse BN scale/shift + ReLU."""
    def kernel(body_ref, halo_ref, w_ref, scale_ref, shift_ref, o_ref, rhs_ref):
        _emit_rhs(body_ref, halo_ref, rhs_ref, kcip=kcip, th=th, wop=wop)
        acc = jnp.dot(w_ref[...], rhs_ref[...], preferred_element_type=jnp.float32)
        y = acc * scale_ref[...] + shift_ref[...]
        o_ref[0] = jnp.maximum(y, 0.0).astype(o_ref.dtype)
    return kernel


def inconv_forward(x_nchw, w_oihw, bias, gamma, beta, *,
                   out_dtype=jnp.float32, input_buffering=None):
    """Pallas implementation of Inconv.forward.

    x_nchw : (N, Ci, H, W) float32
    w_oihw : (Co, Ci, 7, 7) float32 (PyTorch Conv2d weight layout)
    bias   : (Co,) — cancels exactly under training-mode BatchNorm (dropped)
    gamma, beta : (Co,) BatchNorm affine parameters
    out_dtype   : set jnp.bfloat16 if the consumer takes bf16 (halves writeback bytes)
    input_buffering : set 3 on v5e for deeper input prefetch (pl.Buffered); None elsewhere
    """
    del bias  # conv bias added before training-mode BN cancels exactly in (x - mean)

    N, Ci, H, W = x_nchw.shape
    Co = w_oihw.shape[0]
    Ho, Wo = H, W                       # k=7 with reflection pad 3 -> same spatial size
    M = N * Ho * Wo

    WOP = _round_up(max(Wo, 128), 128)  # lane-padded output width (zeros -> exact-zero conv)
    KCI = K * Ci
    KCIP = _round_up(KCI, 8)            # sublane-aligned (kw, ci) tap count
    KKP = K * KCIP                      # full contraction depth of the deep matmul
    TH = _pick_tile_rows(Ho, WOP, N)    # output rows per tile (multiple of 8)
    n_rt = (Ho + TH - 1) // TH
    Ho_p = n_rt * TH
    Hp = Ho + 2 * PAD
    Hp_pad = Ho_p + TH                  # body tiles + one full zero halo tile at the bottom
    TM = TH * WOP                       # lane width of one tile (2048 .. 8192)

    # ---- wrapper glue (pure data movement): reflection pad + 7x kw-expansion, bf16 ----
    xb = x_nchw.astype(jnp.bfloat16)
    xpad = jnp.pad(xb, ((0, 0), (0, 0), (PAD, PAD), (PAD, PAD)), mode="reflect")   # (N,Ci,Hp,Wp)
    taps = jnp.stack([xpad[:, :, :, kw:kw + Wo] for kw in range(K)], axis=1)        # (N,K,Ci,Hp,Wo)
    rtap = taps.reshape(N, KCI, Hp, Wo)
    rtap = jnp.pad(rtap, ((0, 0), (0, KCIP - KCI), (0, Hp_pad - Hp), (0, WOP - Wo)))
    rtap = rtap.reshape(N, KCIP, Hp_pad * WOP)                                       # bf16

    # Conv2d weight (Co, Ci, kh, kw) -> (Co, K*KCIP), columns ordered (kh, kw, ci), zero-padded
    # per kh group to match the rhs scratch row layout.
    wt = jnp.transpose(w_oihw, (0, 2, 3, 1)).reshape(Co, K, KCI)
    wt = jnp.pad(wt, ((0, 0), (0, 0), (0, KCIP - KCI)))
    wmat = wt.reshape(Co, KKP).astype(jnp.bfloat16)

    body_kwargs = {}
    if input_buffering is not None:                       # e.g. 3 on v5e
        body_kwargs["pipeline_mode"] = pl.Buffered(int(input_buffering))
    body_spec = pl.BlockSpec((1, KCIP, TM), lambda n, r: (n, 0, r), **body_kwargs)
    halo_spec = pl.BlockSpec((1, KCIP, HALO * WOP),
                             lambda n, r: (n, 0, (r + 1) * (TH // HALO)))
    w_spec = pl.BlockSpec((Co, KKP), lambda n, r: (0, 0))  # resident across the grid

    cparams = pltpu.CompilerParams(
        dimension_semantics=("parallel", "parallel"),      # fully independent tiles
        vmem_limit_bytes=_vmem_limit_bytes(),
    )
    scratch = [pltpu.VMEM((KKP, TM), jnp.bfloat16)]        # in-VMEM im2col block

    # ---- pass 1: conv recomputable -> per-tile BN partial sums only (no HBM conv dump) ----
    sums, sqs = pl.pallas_call(
        _make_stats_kernel(kcip=KCIP, th=TH, wop=WOP, ho=Ho,
                           need_row_mask=(Ho % TH != 0)),
        out_shape=(
            jax.ShapeDtypeStruct((N, n_rt, Co, 1), jnp.float32),
            jax.ShapeDtypeStruct((N, n_rt, Co, 1), jnp.float32),
        ),
        grid=(N, n_rt),
        in_specs=[body_spec, halo_spec, w_spec],
        out_specs=(
            pl.BlockSpec((1, 1, Co, 1), lambda n, r: (n, r, 0, 0)),
            pl.BlockSpec((1, 1, Co, 1), lambda n, r: (n, r, 0, 0)),
        ),
        scratch_shapes=scratch,
        compiler_params=cparams,
    )(rtap, rtap, wmat)

    # ---- tiny (Co,) reduction + BN folding (training-mode statistics) ----
    s = jnp.sum(sums, axis=(0, 1))[:, 0]
    ss = jnp.sum(sqs, axis=(0, 1))[:, 0]
    mean = s / M
    # E[x^2]-E[x]^2 in f32; fine at these M — for very large M consider compensated sums.
    var = jnp.maximum(ss / M - mean * mean, 0.0)
    scale = gamma * jax.lax.rsqrt(var + BN_EPS)
    shift = beta - mean * scale

    # ---- pass 2: recompute conv, fuse scale/shift + ReLU, lane-dense store in final layout ----
    out_flat = pl.pallas_call(
        _make_apply_kernel(kcip=KCIP, th=TH, wop=WOP),
        out_shape=jax.ShapeDtypeStruct((N, Co, Ho_p * WOP), out_dtype),
        grid=(N, n_rt),
        in_specs=[body_spec, halo_spec, w_spec,
                  pl.BlockSpec((Co, 1), lambda n, r: (0, 0)),
                  pl.BlockSpec((Co, 1), lambda n, r: (0, 0))],
        out_specs=pl.BlockSpec((1, Co, TM), lambda n, r: (n, 0, r)),
        scratch_shapes=scratch,
        compiler_params=cparams,
    )(rtap, rtap, wmat,
      scale.reshape(Co, 1).astype(jnp.float32),
      shift.reshape(Co, 1).astype(jnp.float32))

    # Free reshape; slice is a no-op when Ho % TH == 0 and Wo % 128 == 0 (typical shapes).
    out = out_flat.reshape(N, Co, Ho_p, WOP)[:, :, :Ho, :Wo]
    return out


def inconv_reference(x_nchw, w_oihw, bias, gamma, beta):
    """Pure-JAX reference (bf16-rounded operands, f32 conv accumulation, bias included)."""
    x = x_nchw.astype(jnp.bfloat16).astype(jnp.float32)
    w = w_oihw.astype(jnp.bfloat16).astype(jnp.float32)
    xp = jnp.pad(x, ((0, 0), (0, 0), (PAD, PAD), (PAD, PAD)), mode="reflect")
    conv = jax.lax.conv_general_dilated(
        xp, w, window_strides=(1, 1), padding="VALID",
        dimension_numbers=("NCHW", "OIHW", "NCHW"))
    conv = conv + bias[None, :, None, None]
    mean = conv.mean(axis=(0, 2, 3), keepdims=True)
    var = conv.var(axis=(0, 2, 3), keepdims=True)           # biased, BN training mode
    y = (conv - mean) * jax.lax.rsqrt(var + BN_EPS)
    y = y * gamma[None, :, None, None] + beta[None, :, None, None]
    return jnp.maximum(y, 0.0)


def _run_case(key, n, ci, co, h, w):
    kx, kw, kb, kg, ke = jax.random.split(key, 5)
    x = jax.random.normal(kx, (n, ci, h, w), jnp.float32)
    wgt = jax.random.normal(kw, (co, ci, K, K), jnp.float32) * 0.1
    bias = jax.random.normal(kb, (co,), jnp.float32) * 0.1   # shows it folds away under BN
    gamma = 1.0 + 0.1 * jax.random.normal(kg, (co,), jnp.float32)
    beta = 0.1 * jax.random.normal(ke, (co,), jnp.float32)

    out = jax.block_until_ready(inconv_forward(x, wgt, bias, gamma, beta))
    ref = jax.block_until_ready(inconv_reference(x, wgt, bias, gamma, beta))
    assert out.shape == (n, co, h, w), out.shape
    err = float(jnp.max(jnp.abs(out - ref)))
    assert jnp.allclose(out, ref, rtol=2e-3, atol=2e-3), err
    return err


if __name__ == "__main__":
    key = jax.random.PRNGKey(0)
    k1, k2 = jax.random.split(key)
    # Small, module-consistent shapes (batch=2, channels=4 -> 8, spatial=16).
    _run_case(k1, n=2, ci=4, co=8, h=16, w=16)
    # Second shape exercises the Ho % TH != 0 row-mask path.
    _run_case(k2, n=2, ci=4, co=8, h=12, w=16)
    print("KERNEL_OK")
</pallas_src>

<mosaic_0001>
module attributes {stable_mosaic.version = 11 : i64} {
  func.func @kernel(%arg0: i32, %arg1: i32, %arg2: memref<1x32x2048xbf16, #tpu.memory_space<vmem>>, %arg3: memref<1x32x1024xbf16, #tpu.memory_space<vmem>>, %arg4: memref<8x224xbf16, #tpu.memory_space<vmem>>, %arg5: memref<1x1x8x1xf32, #tpu.memory_space<vmem>>, %arg6: memref<1x1x8x1xf32, #tpu.memory_space<vmem>>, %arg7: memref<224x2048xbf16, #tpu.memory_space<vmem>>) attributes {dimension_semantics = [#tpu.dimension_semantics<parallel>, #tpu.dimension_semantics<parallel>], iteration_bounds = array<i64: 2, 1>, scalar_prefetch = 0 : i64, scratch_operands = 1 : i64, tpu.core_type = #tpu.core_type<tc>, window_params = [{transform_indices = @transform_0, window_bounds = array<i64: 1, 32, 2048>}, {transform_indices = @transform_1, window_bounds = array<i64: 1, 32, 1024>}, {pipeline_mode = #tpu.pipeline_mode<synchronous>, transform_indices = @transform_2, window_bounds = array<i64: 8, 224>}, {transform_indices = @transform_3, window_bounds = array<i64: 1, 1, 8, 1>}, {transform_indices = @transform_4, window_bounds = array<i64: 1, 1, 8, 1>}]} {
    %c0 = arith.constant 0 : index
    %c0_0 = arith.constant 0 : index
    %c0_1 = arith.constant 0 : index
    %0 = vector.load %arg2[%c0, %c0_0, %c0_1] : memref<1x32x2048xbf16, #tpu.memory_space<vmem>>, vector<1x32x2048xbf16>
    %1 = vector.shape_cast %0 : vector<1x32x2048xbf16> to vector<32x2048xbf16>
    %c0_2 = arith.constant 0 : index
    %c0_3 = arith.constant 0 : index
    %2 = vector.load %arg7[%c0_2, %c0_3] : memref<224x2048xbf16, #tpu.memory_space<vmem>>, vector<32x2048xbf16>
    tpu.vector_store %arg7[%c0_2, %c0_3], %1 {strides = array<i32>} : memref<224x2048xbf16, #tpu.memory_space<vmem>>, vector<32x2048xbf16>,
    %c0_4 = arith.constant 0 : index
    %c0_5 = arith.constant 0 : index
    %c128 = arith.constant 128 : index
    %3 = vector.load %arg2[%c0_4, %c0_5, %c128] : memref<1x32x2048xbf16, #tpu.memory_space<vmem>>, vector<1x32x1920xbf16>
    %4 = vector.shape_cast %3 : vector<1x32x1920xbf16> to vector<32x1920xbf16>
    %c32 = arith.constant 32 : index
    %c0_6 = arith.constant 0 : index
    %5 = vector.load %arg7[%c32, %c0_6] : memref<224x2048xbf16, #tpu.memory_space<vmem>>, vector<32x1920xbf16>
    tpu.vector_store %arg7[%c32, %c0_6], %4 {strides = array<i32>} : memref<224x2048xbf16, #tpu.memory_space<vmem>>, vector<32x1920xbf16>,
    %c0_7 = arith.constant 0 : index
    %c0_8 = arith.constant 0 : index
    %c0_9 = arith.constant 0 : index
    %6 = vector.load %arg3[%c0_7, %c0_8, %c0_9] : memref<1x32x1024xbf16, #tpu.memory_space<vmem>>, vector<1x32x128xbf16>
    %7 = vector.shape_cast %6 : vector<1x32x128xbf16> to vector<32x128xbf16>
    %c32_10 = arith.constant 32 : index
    %c1920 = arith.constant 1920 : index
    %8 = vector.load %arg7[%c32_10, %c1920] : memref<224x2048xbf16, #tpu.memory_space<vmem>>, vector<32x128xbf16>
    tpu.vector_store %arg7[%c32_10, %c1920], %7 {strides = array<i32>} : memref<224x2048xbf16, #tpu.memory_space<vmem>>, vector<32x128xbf16>,
    %c0_11 = arith.constant 0 : index
    %c0_12 = arith.constant 0 : index
    %c256 = arith.constant 256 : index
    %9 = vector.load %arg2[%c0_11, %c0_12, %c256] : memref<1x32x2048xbf16, #tpu.memory_space<vmem>>, vector<1x32x1792xbf16>
    %10 = vector.shape_cast %9 : vector<1x32x1792xbf16> to vector<32x1792xbf16>
    %c64 = arith.constant 64 : index
    %c0_13 = arith.constant 0 : index
    %11 = vector.load %arg7[%c64, %c0_13] : memref<224x2048xbf16, #tpu.memory_space<vmem>>, vector<32x1792xbf16>
    tpu.vector_store %arg7[%c64, %c0_13], %10 {strides = array<i32>} : memref<224x2048xbf16, #tpu.memory_space<vmem>>, vector<32x1792xbf16>,
    %c0_14 = arith.constant 0 : index
    %c0_15 = arith.constant 0 : index
    %c0_16 = arith.constant 0 : index
    %12 = vector.load %arg3[%c0_14, %c0_15, %c0_16] : memref<1x32x1024xbf16, #tpu.memory_space<vmem>>, vector<1x32x256xbf16>
    %13 = vector.shape_cast %12 : vector<1x32x256xbf16> to vector<32x256xbf16>
    %c64_17 = arith.constant 64 : index
    %c1792 = arith.constant 1792 : index
    %14 = vector.load %arg7[%c64_17, %c1792] : memref<224x2048xbf16, #tpu.memory_space<vmem>>, vector<32x256xbf16>
    tpu.vector_store %arg7[%c64_17, %c1792], %13 {strides = array<i32>} : memref<224x2048xbf16, #tpu.memory_space<vmem>>, vector<32x256xbf16>,
    %c0_18 = arith.constant 0 : index
    %c0_19 = arith.constant 0 : index
    %c384 = arith.constant 384 : index
    %15 = vector.load %arg2[%c0_18, %c0_19, %c384] : memref<1x32x2048xbf16, #tpu.memory_space<vmem>>, vector<1x32x1664xbf16>
    %16 = vector.shape_cast %15 : vector<1x32x1664xbf16> to vector<32x1664xbf16>
    %c96 = arith.constant 96 : index
    %c0_20 = arith.constant 0 : index
    %17 = vector.load %arg7[%c96, %c0_20] : memref<224x2048xbf16, #tpu.memory_space<vmem>>, vector<32x1664xbf16>
    tpu.vector_store %arg7[%c96, %c0_20], %16 {strides = array<i32>} : memref<224x2048xbf16, #tpu.memory_space<vmem>>, vector<32x1664xbf16>,
    %c0_21 = arith.constant 0 : index
    %c0_22 = arith.constant 0 : index
    %c0_23 = arith.constant 0 : index
    %18 = vector.load %arg3[%c0_21, %c0_22, %c0_23] : memref<1x32x1024xbf16, #tpu.memory_space<vmem>>, vector<1x32x384xbf16>
    %19 = vector.shape_cast %18 : vector<1x32x384xbf16> to vector<32x384xbf16>
    %c96_24 = arith.constant 96 : index
    %c1664 = arith.constant 1664 : index
    %20 = vector.load %arg7[%c96_24, %c1664] : memref<224x2048xbf16, #tpu.memory_space<vmem>>, vector<32x384xbf16>
    tpu.vector_store %arg7[%c96_24, %c1664], %19 {strides = array<i32>} : memref<224x2048xbf16, #tpu.memory_space<vmem>>, vector<32x384xbf16>,
    %c0_25 = arith.constant 0 : index
    %c0_26 = arith.constant 0 : index
    %c512 = arith.constant 512 : index
    %21 = vector.load %arg2[%c0_25, %c0_26, %c512] : memref<1x32x2048xbf16, #tpu.memory_space<vmem>>, vector<1x32x1536xbf16>
    %22 = vector.shape_cast %21 : vector<1x32x1536xbf16> to vector<32x1536xbf16>
    %c128_27 = arith.constant 128 : index
    %c0_28 = arith.constant 0 : index
    %23 = vector.load %arg7[%c128_27, %c0_28] : memref<224x2048xbf16, #tpu.memory_space<vmem>>, vector<32x1536xbf16>
    tpu.vector_store %arg7[%c128_27, %c0_28], %22 {strides = array<i32>} : memref<224x2048xbf16, #tpu.memory_space<vmem>>, vector<32x1536xbf16>,
    %c0_29 = arith.constant 0 : index
    %c0_30 = arith.constant 0 : index
    %c0_31 = arith.constant 0 : index
    %24 = vector.load %arg3[%c0_29, %c0_30, %c0_31] : memref<1x32x1024xbf16, #tpu.memory_space<vmem>>, vector<1x32x512xbf16>
    %25 = vector.shape_cast %24 : vector<1x32x512xbf16> to vector<32x512xbf16>
    %c128_32 = arith.constant 128 : index
    %c1536 = arith.constant 1536 : index
    %26 = vector.load %arg7[%c128_32, %c1536] : memref<224x2048xbf16, #tpu.memory_space<vmem>>, vector<32x512xbf16>
    tpu.vector_store %arg7[%c128_32, %c1536], %25 {strides = array<i32>} : memref<224x2048xbf16, #tpu.memory_space<vmem>>, vector<32x512xbf16>,
    %c0_33 = arith.constant 0 : index
    %c0_34 = arith.constant 0 : index
    %c640 = arith.constant 640 : index
    %27 = vector.load %arg2[%c0_33, %c0_34, %c640] : memref<1x32x2048xbf16, #tpu.memory_space<vmem>>, vector<1x32x1408xbf16>
    %28 = vector.shape_cast %27 : vector<1x32x1408xbf16> to vector<32x1408xbf16>
    %c160 = arith.constant 160 : index
    %c0_35 = arith.constant 0 : index
    %29 = vector.load %arg7[%c160, %c0_35] : memref<224x2048xbf16, #tpu.memory_space<vmem>>, vector<32x1408xbf16>
    tpu.vector_store %arg7[%c160, %c0_35], %28 {strides = array<i32>} : memref<224x2048xbf16, #tpu.memory_space<vmem>>, vector<32x1408xbf16>,
    %c0_36 = arith.constant 0 : index
    %c0_37 = arith.constant 0 : index
    %c0_38 = arith.constant 0 : index
    %30 = vector.load %arg3[%c0_36, %c0_37, %c0_38] : memref<1x32x1024xbf16, #tpu.memory_space<vmem>>, vector<1x32x640xbf16>
    %31 = vector.shape_cast %30 : vector<1x32x640xbf16> to vector<32x640xbf16>
    %c160_39 = arith.constant 160 : index
    %c1408 = arith.constant 1408 : index
    %32 = vector.load %arg7[%c160_39, %c1408] : memref<224x2048xbf16, #tpu.memory_space<vmem>>, vector<32x640xbf16>
    tpu.vector_store %arg7[%c160_39, %c1408], %31 {strides = array<i32>} : memref<224x2048xbf16, #tpu.memory_space<vmem>>, vector<32x640xbf16>,
    %c0_40 = arith.constant 0 : index
    %c0_41 = arith.constant 0 : index
    %c768 = arith.constant 768 : index
    %33 = vector.load %arg2[%c0_40, %c0_41, %c768] : memref<1x32x2048xbf16, #tpu.memory_space<vmem>>, vector<1x32x1280xbf16>
    %34 = vector.shape_cast %33 : vector<1x32x1280xbf16> to vector<32x1280xbf16>
    %c192 = arith.constant 192 : index
    %c0_42 = arith.constant 0 : index
    %35 = vector.load %arg7[%c192, %c0_42] : memref<224x2048xbf16, #tpu.memory_space<vmem>>, vector<32x1280xbf16>
    tpu.vector_store %arg7[%c192, %c0_42], %34 {strides = array<i32>} : memref<224x2048xbf16, #tpu.memory_space<vmem>>, vector<32x1280xbf16>,
    %c0_43 = arith.constant 0 : index
    %c0_44 = arith.constant 0 : index
    %c0_45 = arith.constant 0 : index
    %36 = vector.load %arg3[%c0_43, %c0_44, %c0_45] : memref<1x32x1024xbf16, #tpu.memory_space<vmem>>, vector<1x32x768xbf16>
    %37 = vector.shape_cast %36 : vector<1x32x768xbf16> to vector<32x768xbf16>
    %c192_46 = arith.constant 192 : index
    %c1280 = arith.constant 1280 : index
    %38 = vector.load %arg7[%c192_46, %c1280] : memref<224x2048xbf16, #tpu.memory_space<vmem>>, vector<32x768xbf16>
    tpu.vector_store %arg7[%c192_46, %c1280], %37 {strides = array<i32>} : memref<224x2048xbf16, #tpu.memory_space<vmem>>, vector<32x768xbf16>,
    %c0_47 = arith.constant 0 : index
    %c0_48 = arith.constant 0 : index
    %39 = vector.load %arg4[%c0_47, %c0_48] : memref<8x224xbf16, #tpu.memory_space<vmem>>, vector<8x224xbf16>
    %c0_49 = arith.constant 0 : index
    %c0_50 = arith.constant 0 : index
    %40 = vector.load %arg7[%c0_49, %c0_50] : memref<224x2048xbf16, #tpu.memory_space<vmem>>, vector<224x2048xbf16>
    %cst = arith.constant dense<0.000000e+00> : vector<8x2048xf32>
    %41 = tpu.matmul %39, %40, %cst {dimension_numbers = #tpu.dot_dimension_numbers<[1], [0], [0], [1], [0, 0, 1, 1], [], []>} : vector<8x224xbf16>, vector<224x2048xbf16>, vector<8x2048xf32> -> vector<8x2048xf32>
    %cst_51 = arith.constant dense<0.000000e+00> : vector<8xf32>
    %42 = vector.multi_reduction <add>, %41, %cst_51 [1] : vector<8x2048xf32> to vector<8xf32>
    %43 = vector.shape_cast %42 : vector<8xf32> to vector<8x1xf32>
    %c0_52 = arith.constant 0 : index
    %c0_53 = arith.constant 0 : index
    %c0_54 = arith.constant 0 : index
    %c0_55 = arith.constant 0 : index
    %44 = vector.load %arg5[%c0_52, %c0_53, %c0_54, %c0_55] : memref<1x1x8x1xf32, #tpu.memory_space<vmem>>, vector<1x1x8x1xf32>
    %45 = vector.shape_cast %44 : vector<1x1x8x1xf32> to vector<8x1xf32>
    %46 = vector.shape_cast %43 : vector<8x1xf32> to vector<1x1x8x1xf32>
    tpu.vector_store %arg5[%c0_52, %c0_53, %c0_54, %c0_55], %46 {strides = array<i32>} : memref<1x1x8x1xf32, #tpu.memory_space<vmem>>, vector<1x1x8x1xf32>,
    %47 = arith.mulf %41, %41 : vector<8x2048xf32>
    %cst_56 = arith.constant dense<0.000000e+00> : vector<8xf32>
    %48 = vector.multi_reduction <add>, %47, %cst_56 [1] : vector<8x2048xf32> to vector<8xf32>
    %49 = vector.shape_cast %48 : vector<8xf32> to vector<8x1xf32>
    %c0_57 = arith.constant 0 : index
    %c0_58 = arith.constant 0 : index
    %c0_59 = arith.constant 0 : index
    %c0_60 = arith.constant 0 : index
    %50 = vector.load %arg6[%c0_57, %c0_58, %c0_59, %c0_60] : memref<1x1x8x1xf32, #tpu.memory_space<vmem>>, vector<1x1x8x1xf32>
    %51 = vector.shape_cast %50 : vector<1x1x8x1xf32> to vector<8x1xf32>
    %52 = vector.shape_cast %49 : vector<8x1xf32> to vector<1x1x8x1xf32>
    tpu.vector_store %arg6[%c0_57, %c0_58, %c0_59, %c0_60], %52 {strides = array<i32>} : memref<1x1x8x1xf32, #tpu.memory_space<vmem>>, vector<1x1x8x1xf32>,
    return
  }
  func.func @transform_0(%arg0: i32, %arg1: i32) -> (i32, i32, i32) {
    %c0_i32 = arith.constant 0 : i32
    %c0_i32_0 = arith.constant 0 : i32
    return %arg0, %c0_i32, %arg1 : i32, i32, i32
  }
  func.func @transform_1(%arg0: i32, %arg1: i32) -> (i32, i32, i32) {
    %c1_i32 = arith.constant 1 : i32
    %0 = arith.addi %arg1, %c1_i32 : i32
    %c2_i32 = arith.constant 2 : i32
    %1 = arith.muli %0, %c2_i32 : i32
    %c0_i32 = arith.constant 0 : i32
    %c0_i32_0 = arith.constant 0 : i32
    return %arg0, %c0_i32, %1 : i32, i32, i32
  }
  func.func @transform_2(%arg0: i32, %arg1: i32) -> (i32, i32) {
    %c0_i32 = arith.constant 0 : i32
    %c0_i32_0 = arith.constant 0 : i32
    %c0_i32_1 = arith.constant 0 : i32
    return %c0_i32, %c0_i32_0 : i32, i32
  }
  func.func @transform_3(%arg0: i32, %arg1: i32) -> (i32, i32, i32, i32) {
    %c0_i32 = arith.constant 0 : i32
    %c0_i32_0 = arith.constant 0 : i32
    %c0_i32_1 = arith.constant 0 : i32
    return %arg0, %arg1, %c0_i32, %c0_i32_0 : i32, i32, i32, i32
  }
  func.func @transform_4(%arg0: i32, %arg1: i32) -> (i32, i32, i32, i32) {
    %c0_i32 = arith.constant 0 : i32
    %c0_i32_0 = arith.constant 0 : i32
    %c0_i32_1 = arith.constant 0 : i32
    return %arg0, %arg1, %c0_i32, %c0_i32_0 : i32, i32, i32, i32
  }
}

</mosaic_0001>

<bundles_post_ra>
// kernel: tpu_custom_call.1
= control target key start
LH: loop header
LB: loop body
LE: loop exit
PB: predicated region body
PF: predicated region fallthrough
CT: control target
= control target key end

     0   :  { %s3976_s0 = inlined_call_operand.hbm [shape: bf16[2,32,4096], index: 0, kind: input, shape index: {}]   ;;  %s3977_s1 = inlined_call_operand.hbm [shape: bf16[2,32,4096], index: 1, kind: input, shape index: {}]   ;;  %s3978_s2 = inlined_call_operand.hbm [shape: bf16[8,224], index: 2, kind: input, shape index: {}]   ;;  %s3979_s3 = inlined_call_operand.vmem [shape: f32[2,1,8,1], index: 3, kind: output, shape index: {0}]   ;;  %s3980_s4 = inlined_call_operand.vmem [shape: f32[2,1,8,1], index: 4, kind: output, shape index: {1}]  }
   0x1   :  { %3996 = sst [smem:[#allocation21_spill]] %s3976_s0 }
   0x2   :  { %3997 = sst [smem:[#allocation22_spill]] %s3977_s1 }
   0x3   :  { %3998 = sst [smem:[#allocation23_spill]] %s3978_s2 }
   0x4   :  { %10 = vsyncpa [#allocation4], 0 }
   0x5   :  { %12 = vsyncpa [#allocation4 + $0x1], 0 }
   0x6   :  { %13 = vsyncpa [#allocation6], 0 }
   0x7   :  { %15 = vsyncpa [#allocation6 + $0x1], 0  ;;  %s3206_s15 = smov 0   ;;  %s3208_s16 = smov 0  }
   0x8   :  { %s3210_s17 = smov 0   ;;  %s3212_s18 = smov 0  }
   0x9   :  { %s3214_s19 = smov 0   ;;  %s3216_s20 = smov 0  }
   0xa LB: > { %s3983_s21 = sadd.s32 4294967295, %s3171_s20   ;;  %s42_s22 = sadd.s32 1, %s3159_s17  ;;  %s3171_s20 = sphi %s3216_s20, %s21_s20   ;;  %s3167_s19 = sphi %s3214_s19, %s4037_s19   ;;  %s3163_s18 = sphi %s3212_s18, %s4036_s18   ;;  %s3159_s17 = sphi %s3210_s17, %s4035_s17   ;;  %s3155_s16 = sphi %s3208_s16, %s4034_s16   ;;  %s3151_s15 = sphi %s3206_s15, %s4033_s15  }
   0xb   : > { %p49_p0 = scmp.ne.s32.totalorder %s3159_s17, %s3155_s16  ;;  %p50_p1 = scmp.eq.s32.totalorder %s3171_s20, 0 }
   0xc   : > { %p55_p2 = scmp.ne.s32.totalorder %s3155_s16, %s3151_s15  ;;  %p3242_p3 = scmp.eq.s32.totalorder %s3983_s21, 0 }
   0xd   : > { %p51_p4 = por %p50_p1, %p49_p0  ;;  %p2699_p5 = scmp.ge.s32.totalorder %s3171_s20, 1 }
   0xe   : > { %p3249_p6 = por %p3242_p3, %p55_p2  ;;  %p175_p7 = scmp.lt.s32.totalorder %s3171_s20, 3 }
   0xf   : > { %s3173_s26 = smov [#allocation7]   ;;  %p2972_p10 = scmp.lt.s32.totalorder %s3171_s20, 2 }
  0x10   : > { %s4000_s24 = scalar_select %p3249_p6, 1, 0 }
  0x11   : > { %p3254_p8 = pnand %p2699_p5, %p175_p7  ;;  %s188_s27 = sshll.u32 %s3173_s26, 4  ;;  %s189_s27 = int_to_ptr.vmem [resolvable:$true] %s188_s27 }
  0x12   : > { %s3262_s28 = sand.u32 1, %s3159_s17   ;;  %p3266_p12 = pnand %p2972_p10, %p51_p4 }
  0x13   : > { %s4001_s25 = scalar_select %p3254_p8, 1, 0 }
  0x14   : > { %p2960_p9 = pneg %p3254_p8  ;;  %s3041_s30 = scalar_lea.vmem %s189_s27, 128 }
  0x15   : > { %p3042_p0 = scmp.ne.s32.totalorder %s189_s27, %s3041_s30  ;;  %p3049_p5 = scmp.lt.s32.totalorder %s189_s27, %s189_s27 }
  0x16   : > { %p2961_p11 = pnand %p2960_p9, %p3242_p3  ;;  %p3050_p7 = scmp.lt.s32.totalorder %s3041_s30, %s3041_s30 }
  0x18   : > { %p3032_p13 = pneg %p2961_p11  ;;  %p3051_p6 = por %p3050_p7, %p3049_p5 }
  0x1a   : > { %p3044_p1 = pnand %p3042_p0, %p3032_p13 }
  0x1c   : > { %p3045_p2 = pneg %p3044_p1 }
  0x1e   : > { %p3052_p8 = pnand %p3051_p6, %p3045_p2 }
  0x20   : > { %3055 = shalt.err (!%p3052_p8)
}
  0x21   : > { %s4003_s2 = sld [smem:[#allocation23_spill]]  ;;  %s33_s7 = sadd.s32 1, %s3167_s19 }
  0x22   : > { %s2702_s8 = sshll.u32 %s3262_s28, 8  ;;  %p35_p4 = scmp.ge.s32.totalorder %s33_s7, 2 }
  0x23   : > { %s2950_s9 = sshll.u32 %s3167_s19, 13  ;;  %s203_s10 = scalar_lea.vmem [#allocation3], %s2702_s8 }
  0x24   : > { %s212_s11 = sshll.u32 %s203_s10, 4  ;;  %s4039_s7 = smov (%p35_p4, %s33_s7), 0  ;;  %s213_s11 = int_to_ptr.vmem [resolvable:$true] %s212_s11 }
  0x25   : > { %s4004_s0 = sld [smem:[#allocation21_spill]]  ;;  %s37_s15 = ssub.s32 %s3167_s19, %s4039_s7 }
  0x26   : > { %p40_p6 = scmp.eq.s32.totalorder %s37_s15, 0  ;;  %s4005_s1 = sld [smem:[#allocation22_spill]] }
  0x27   : > { %2963 = dma.hbm_to_vmem [thread:$0]  (!%p2961_p11), %s4003_s2, 128, %s189_s27, [#allocation6]  }
  0x28   : > { %s3291_s5 = scalar_select %p40_p6, %s3159_s17, %s42_s22  }
  0x29   : > { %s200_s6 = scalar_lea.sflag [#allocation4], %s3262_s28  ;;  %p3058_p8 = pneg %p3266_p12 }
  0x2a   : > { %s3069_s8 = scalar_lea.vmem %s213_s11, 4096  ;;  %s3174_s10 = smov [#allocation3]  }
  0x2b   : > { %s211_s14 = scalar_lea.hbm %s4004_s0, %s2950_s9  ;;  %p3070_p9 = scmp.ne.s32.totalorder %s213_s11, %s3069_s8 }
  0x2c   : > { %s3286_s27 = scalar_lea.hbm %s4005_s1, %s2950_s9  ;;  %s3074_s12 = sshll.u32 %s3174_s10, 4  ;;  %s3075_s12 = int_to_ptr.vmem [resolvable:$false] %s3074_s12 }
  0x2d   : > { %p3072_p10 = pnand %p3070_p9, %p3058_p8  ;;  %s3076_s13 = scalar_lea.vmem %s3075_s12, 8192 }
  0x2e   : > { %p3077_p13 = scmp.lt.s32.totalorder %s213_s11, %s3075_s12  ;;  %p3078_p0 = scmp.lt.s32.totalorder %s3076_s13, %s3069_s8 }
  0x2f   : > { %p3073_p11 = pneg %p3072_p10 }
  0x30   : > { %p3079_p1 = por %p3078_p0, %p3077_p13 }
  0x32   : > { %p3080_p2 = pnand %p3079_p1, %p3073_p11 }
  0x34   : > { %3083 = shalt.err (!%p3080_p2)
}
  0x35   : > { %s3175_s22 = smov 2048   ;;  %s3176_s9 = smov 1024  }
  0x36   : > { %s3177_s15 = smov 64   ;;  %s2601_s26 = scalar_lea.hbm %s3286_s27, 1024 }
  0x37   : > { %2967 = dma.hbm_to_vmem [thread:$0]  (!%p3266_p12), %s211_s14, 4096, %s213_s11, %s200_s6, %s3175_s22, %s3176_s9, %s3177_s15  }
  0x38   : > { %s222_s30 = sand.u32 1, %s3171_s20   ;;  %s2705_s10 = sshll.u32 %s3262_s28, 7 }
  0x39   : > { %s226_s21 = scalar_lea.vmem [#allocation5], %s2705_s10  ;;  %s223_s8 = scalar_lea.sflag [#allocation6], %s222_s30 }
  0x3a   : > { %s237_s12 = sshll.u32 %s226_s21, 4  ;;  %s3178_s0 = smov [#allocation5]   ;;  %s238_s12 = int_to_ptr.vmem [resolvable:$true] %s237_s12 }
  0x3b   : > { %s3097_s13 = scalar_lea.vmem %s238_s12, 2048  ;;  %s3102_s1 = sshll.u32 %s3178_s0, 4  ;;  %s3103_s1 = int_to_ptr.vmem [resolvable:$false] %s3102_s1 }
  0x3c   : > { %p3098_p5 = scmp.ne.s32.totalorder %s238_s12, %s3097_s13  ;;  %s3104_s2 = scalar_lea.vmem %s3103_s1, 4096 }
  0x3d   : > { %p3105_p6 = scmp.lt.s32.totalorder %s238_s12, %s3103_s1  ;;  %p3106_p9 = scmp.lt.s32.totalorder %s3104_s2, %s3097_s13 }
  0x3e   : > { %p3100_p7 = pnand %p3098_p5, %p3058_p8 }
  0x3f   : > { %p3107_p10 = por %p3106_p9, %p3105_p6 }
  0x40   : > { %p3101_p4 = pneg %p3100_p7 }
  0x42   : > { %p3108_p11 = pnand %p3107_p10, %p3101_p4 }
  0x44   : > { %3111 = shalt.err (!%p3108_p11)
}
  0x45   : > { %s3179_s28 = smov 512   ;;  %s3180_s21 = smov 32  }
  0x46   : > { %2970 = dma.hbm_to_vmem [thread:$0]  (!%p3266_p12), %s2601_s26, 2048, %s238_s12, %s223_s8, %s3175_s22, %s3179_s28, %s3180_s21  }
  0x47   : > { %p4006_p13 = scmp.ne.s32.totalorder %s4001_s25, 0 }
  0x49   : > { %249 = sbr.rel (%p4006_p13) target bundleno = 660 (0x294), region = 32 }
  0x4e   : > { %s251_s11 = sand.u32 1, %s3155_s16   ;;  %p4007_p8 = scmp.ne.s32.totalorder %s4000_s24, 0 }
  0x4f   : > { %s2709_s0 = sshll.u32 %s251_s11, 8  ;;  %s252_s14 = scalar_lea.sflag [#allocation4], %s251_s11 }
  0x50   : > { %s3314_s27 = scalar_lea.vmem [#allocation3], %s2709_s0 }
  0x51   : > { %3138 = dma.done.wait (%p4007_p8), %s252_s14, 4096  }
  0x52   : > { %3140 = vsyncadd (%p4007_p8), %s252_s14, 4294963200  ;;  %s4008_s1 = sadd.s32 4294967295, %s3171_s20   ;;  %s2710_s29 = sshll.u32 %s251_s11, 7 }
  0x53   : > { %s260_s2 = sand.u32 1, %s4008_s1   ;;  %s3322_s25 = scalar_lea.vmem [#allocation5], %s2710_s29 }
  0x54   : > { %s261_s6 = scalar_lea.sflag [#allocation6], %s260_s2 }
  0x55   : > { %3142 = dma.done.wait (%p4007_p8), %s261_s6, 2048  }
  0x56   : > { %3144 = vsyncadd (%p4007_p8), %s261_s6, 4294965248 }
  0x57   : > { %3146 = dma.done.wait (%p3242_p3), [#allocation6], 128  }
  0x58   : > { %3148 = vsyncadd (%p3242_p3), [#allocation6], 4294967168  ;;  %v540_v0 = vld [vmem:[%s3314_s27 + $0x8c] sm:$0xff]  ;;  %v541_v2 = vld [vmem:[%s3314_s27 + $0x94] sm:$0xff]  ;;  %vm2149_vm0 = vcmask 785408   ;;  %p311_p3 = scmp.lt.s32.totalorder %s3163_s18, 1 }
  0x59   : > { %v547_v1 = vld [vmem:[%s3314_s27 + $0xcc] sm:$0xff]  ;;  %v548_v4 = vld [vmem:[%s3314_s27 + $0xd4] sm:$0xff]  ;;  %v3372_v25 = vld [vmem:[%s3314_s27 + $0x84] sm:$0xff]  ;;  %vm2498_vm1 = vcmask 7168  }
  0x5a   : > { %v3335_v3 = vcombine.high %v540_v0, %v547_v1  ;;  %v3338_v5 = vcombine.low %v540_v0, %v547_v1  ;;  %v526_v6 = vld [vmem:[%s3314_s27 + $0xc] sm:$0xff]  ;;  %v3342_v8 = vcombine.high %v541_v2, %v548_v4  ;;  %v3344_v9 = vcombine.low %v541_v2, %v548_v4  ;;  %v527_v11 = vld [vmem:[%s3314_s27 + $0x14] sm:$0xff]  ;;  %v3375_v26 = vld [vmem:[%s3314_s27 + $0xc4] sm:$0xff]  ;;  %s4041_s18 = smov (!%p311_p3, %s3163_s18), 1 }
  0x5b   : > { %v533_v7 = vld [vmem:[%s3314_s27 + $0x4c] sm:$0xff]  ;;  %v534_v12 = vld [vmem:[%s3314_s27 + $0x54] sm:$0xff]  ;;  %v3381_v28 = vld [vmem:[%s3314_s27 + $0x4] sm:$0xff]  ;;  %v2765_v55 = vcombine.high %v3372_v25, %v3375_v26  ;;  %v2764_v60 = vcombine.low %v3372_v25, %v3375_v26  ;;  %s2712_s23 = sshll.u32 %s4041_s18, 3 }
  0x5c   : > { %v3346_v10 = vcombine.high %v526_v6, %v533_v7  ;;  %v476_v13 = vld [vmem:[%s3314_s27 + $0x88] sm:$0xff]  ;;  %2153 = vmatprep.subr.bf16.mxu0 %v3335_v3  ;;  %v3352_v14 = vcombine.high %v527_v11, %v534_v12  ;;  %v477_v16 = vld [vmem:[%s3314_s27 + $0x90] sm:$0xff]  ;;  %2194 = vmatprep.subr.bf16.mxu1 %v3342_v8  ;;  %v3359_v18 = vcombine.low %v526_v6, %v533_v7  ;;  %v3387_v30 = vld [vmem:[%s3314_s27 + $0x80] sm:$0xff]  ;;  %s317_s9 = scalar_lea.vmem %s3979_s3, %s2712_s23  ;;  %s324_s30 = scalar_lea.vmem %s3980_s4, %s2712_s23 }
  0x5d   : > { %v483_v15 = vld [vmem:[%s3314_s27 + $0xc8] sm:$0xff]  ;;  %v484_v17 = vld [vmem:[%s3314_s27 + $0xd0] sm:$0xff]  ;;  %2154 = vmatpush1.bf16.msra.mxu0 %v3338_v5  ;;  %2195 = vmatpush1.bf16.msra.mxu1 %v3344_v9  ;;  %v3366_v22 = vcombine.low %v527_v11, %v534_v12  ;;  %v3390_v31 = vld [vmem:[%s3314_s27 + $0xc0] sm:$0xff] }
  0x5e   : > { %v462_v19 = vld [vmem:[%s3314_s27 + $0x8] sm:$0xff]  ;;  %v463_v21 = vld [vmem:[%s3314_s27 + $0x10] sm:$0xff]  ;;  %2155 = vmatprep.subr.bf16.mxu0 %v3346_v10  ;;  %v3368_v23 = vcombine.high %v476_v13, %v483_v15  ;;  %2196 = vmatprep.subr.bf16.mxu1 %v3352_v14  ;;  %v3378_v27 = vcombine.high %v477_v16, %v484_v17  ;;  %v3393_v32 = vld [vmem:[%s3314_s27] sm:$0xff]  ;;  %v3399_v34 = vcombine.low %v476_v13, %v483_v15 }
  0x5f   : > { %v469_v20 = vld [vmem:[%s3314_s27 + $0x48] sm:$0xff]  ;;  %v470_v24 = vld [vmem:[%s3314_s27 + $0x50] sm:$0xff]  ;;  %v3396_v33 = vld [vmem:[%s3314_s27 + $0x40] sm:$0xff]  ;;  %v3412_v38 = vcombine.low %v477_v16, %v484_v17 }
  0x60   : > { %v3384_v29 = vld [vmem:[%s3314_s27 + $0x44] sm:$0xff]  ;;  %v3402_v35 = vld [vmem:[%s3314_s27 + $0x98] sm:$0xff]  ;;  %v3414_v39 = vcombine.high %v462_v19, %v469_v20  ;;  %v3426_v43 = vcombine.high %v463_v21, %v470_v24  ;;  %v3447_v50 = vcombine.low %v462_v19, %v469_v20  ;;  %v3459_v54 = vcombine.low %v463_v21, %v470_v24  ;;  %v747_v62 = vld [vmem:[%s3314_s27 + $0xb0] sm:$0xff] }
  0x61   : > { %2156 = vmatpush1.bf16.msra.mxu0 %v3359_v18  ;;  %v3405_v36 = vld [vmem:[%s3314_s27 + $0xd8] sm:$0xff]  ;;  %v3408_v37 = vld [vmem:[%s3314_s27 + $0xa0] sm:$0xff]  ;;  %2197 = vmatpush1.bf16.msra.mxu1 %v3366_v22  ;;  %v746_v59 = vld [vmem:[%s3314_s27 + $0xa8] sm:$0xff]  ;;  %v2749_v11 = vcombine.high %v3381_v28, %v3384_v29 }
  0x62   : > { %2157 = vmatprep.subr.bf16.mxu0 %v3368_v23  ;;  %v3417_v40 = vld [vmem:[%s3314_s27 + $0xe0] sm:$0xff]  ;;  %v3420_v41 = vld [vmem:[%s3314_s27 + $0x18] sm:$0xff]  ;;  %2198 = vmatprep.subr.bf16.mxu1 %v3378_v27  ;;  %v751_v61 = vld [vmem:[%s3314_s27 + $0xe8] sm:$0xff] }
  0x63   : > { %v3423_v42 = vld [vmem:[%s3314_s27 + $0x58] sm:$0xff]  ;;  %v3429_v44 = vld [vmem:[%s3314_s27 + $0x20] sm:$0xff]  ;;  %v752_v63 = vld [vmem:[%s3314_s27 + $0xf0] sm:$0xff]  ;;  %v3484_v0 = vcombine.low %v746_v59, %v751_v61  ;;  %v3486_v1 = vcombine.high %v746_v59, %v751_v61 }
  0x64   : > { %v3432_v45 = vld [vmem:[%s3314_s27 + $0x60] sm:$0xff]  ;;  %v3488_v2 = vcombine.low %v747_v62, %v752_v63  ;;  %v736_v4 = vld [vmem:[%s3314_s27 + $0x28] sm:$0xff]  ;;  %v737_v7 = vld [vmem:[%s3314_s27 + $0x30] sm:$0xff]  ;;  %v3496_v12 = vcombine.high %v747_v62, %v752_v63 }
  0x65   : > { %v3435_v46 = vld [vmem:[%s3314_s27 + $0x9c] sm:$0xff]  ;;  %2158 = vmatpush1.bf16.msra.mxu0 %v3399_v34  ;;  %v3452_v52 = vld [vmem:[%s3314_s27 + $0xa4] sm:$0xff]  ;;  %2199 = vmatpush1.bf16.msra.mxu1 %v3412_v38  ;;  %v742_v16 = vld [vmem:[%s3314_s27 + $0x70] sm:$0xff] }
  0x66   : > { %v3438_v47 = vld [vmem:[%s3314_s27 + $0xdc] sm:$0xff]  ;;  %v3455_v53 = vld [vmem:[%s3314_s27 + $0xe4] sm:$0xff]  ;;  %2159 = vmatprep.subr.bf16.mxu0 %v3414_v39  ;;  %2200 = vmatprep.subr.bf16.mxu1 %v3426_v43  ;;  %v677_v17 = vld [vmem:[%s3314_s27 + $0xac] sm:$0xff]  ;;  %v3506_v20 = vcombine.low %v737_v7, %v742_v16  ;;  %v3508_v21 = vcombine.high %v737_v7, %v742_v16 }
  0x67   : > { %v3441_v48 = vld [vmem:[%s3314_s27 + $0x1c] sm:$0xff]  ;;  %v3468_v57 = vld [vmem:[%s3314_s27 + $0x24] sm:$0xff]  ;;  %v683_v19 = vld [vmem:[%s3314_s27 + $0xec] sm:$0xff] }
  0x68   : > { %v3444_v49 = vld [vmem:[%s3314_s27 + $0x5c] sm:$0xff]  ;;  %v3471_v58 = vld [vmem:[%s3314_s27 + $0x64] sm:$0xff]  ;;  %4009 = vst [vmem:[#allocation11_spill] sm:$0xff] %v3506_v20  ;;  %v3510_v24 = vcombine.low %v677_v17, %v683_v19  ;;  %v665_v25 = vld [vmem:[%s3314_s27 + $0x2c] sm:$0xff]  ;;  %v3516_v61 = vcombine.high %v677_v17, %v683_v19 }
  0x69   : > { %v3449_v51 = vld [vmem:[#allocation7] sm:$0xff]  ;;  %v741_v6 = vld [vmem:[%s3314_s27 + $0x68] sm:$0xff]  ;;  %2160 = vmatpush1.bf16.msra.mxu0 %v3447_v50  ;;  %2201 = vmatpush1.bf16.msra.mxu1 %v3459_v54  ;;  %v545_v59 = vld [vmem:[%s3314_s27 + $0xb4] sm:$0xff] }
  0x6a   : > { %v3465_v56 = vcombine.high %v3449_v51, %v3449_v51  ;;  %v3498_v13 = vcombine.low %v736_v4, %v741_v6  ;;  %v3500_v15 = vcombine.high %v736_v4, %v741_v6  ;;  %2161 = vmatprep.subr.bf16.mxu0 %v2765_v55  ;;  %4010 = vst [vmem:[#allocation12_spill] sm:$0xff] %v3510_v24  ;;  %v671_v26 = vld [vmem:[%s3314_s27 + $0x6c] sm:$0xff]  ;;  %v552_v55 = vld [vmem:[%s3314_s27 + $0xf4] sm:$0xff]  ;;  %v3537_v17 = vld [vmem:[%s3314_s27 + $0xe0] sm:$0xff] }
  0x6b   : > { %2202 = vmatprep.subr.bf16.mxu1 %v3335_v3  ;;  %v3518_v62 = vcombine.low %v665_v25, %v671_v26  ;;  %v3520_v63 = vcombine.high %v665_v25, %v671_v26  ;;  %v531_v4 = vld [vmem:[%s3314_s27 + $0x34] sm:$0xff]  ;;  %v3525_v7 = vcombine.low %v545_v59, %v552_v55  ;;  %v3527_v16 = vcombine.high %v545_v59, %v552_v55  ;;  %v3534_v3 = vld [vmem:[%s3314_s27 + $0xa0] sm:$0xff] }
  0x6c   : > { %2940 = vmatprep.mubr.msk.bf16.mxu0 %vm2149_vm0, %v3465_v56  ;;  %2941 = vmatprep.mubr.msk.bf16.mxu1 %vm2149_vm0, %v3465_v56  ;;  %v538_v6 = vld [vmem:[%s3314_s27 + $0x74] sm:$0xff]  ;;  %4014 = vst [vmem:[#allocation16_spill] sm:$0xff] %v3534_v3  ;;  %4015 = vst [vmem:[#allocation17_spill] sm:$0xff] %v3537_v17  ;;  %v3540_v19 = vld [vmem:[%s3314_s27 + $0x20] sm:$0xff]  ;;  %v2748_v25 = vcombine.low %v3381_v28, %v3384_v29  ;;  %v2733_v26 = vcombine.high %v3387_v30, %v3390_v31 }
  0x6d   : > { %4011 = vst [vmem:[#allocation13_spill] sm:$0xff] %v3525_v7  ;;  %v3529_v24 = vcombine.low %v531_v4, %v538_v6  ;;  %v3531_v20 = vcombine.high %v531_v4, %v538_v6  ;;  %2162 = vmatpush1.bf16.msra.mxu0 %v2764_v60  ;;  %v3551_v4 = vld [vmem:[%s3314_s27 + $0x60] sm:$0xff]  ;;  %v748_v6 = vld [vmem:[%s3314_s27 + $0xb8] sm:$0xff]  ;;  %2203 = vmatpush1.bf16.msra.mxu1 %v3338_v5 }
  0x6e   : > { %2163 = vmatprep.subr.bf16.mxu0 %v2749_v11  ;;  %v780_v59 = vld [vmem:[%s3322_s25 + $0x40] sm:$0xff]  ;;  %v738_v17 = vld [vmem:[%s3314_s27 + $0x38] sm:$0xff]  ;;  %2204 = vmatprep.subr.bf16.mxu1 %v3346_v10 }
  0x6f   : > { %4012 = vst [vmem:[#allocation14_spill] sm:$0xff] %v3529_v24  ;;  %4013 = vst [vmem:[#allocation15_spill] sm:$0xff] %v3531_v20  ;;  %v753_v24 = vld [vmem:[%s3314_s27 + $0xf8] sm:$0xff]  ;;  %v783_v55 = vld [vmem:[%s3322_s25 + $0x60] sm:$0xff] }
  0x70   : > { %v3560_v60 = vcombine.low %v748_v6, %v753_v24  ;;  %v3566_v3 = vcombine.high %v748_v6, %v753_v24  ;;  %v3568_v5 = vcombine.low %v780_v59, %v783_v55  ;;  %v3570_v11 = vcombine.high %v780_v59, %v783_v55  ;;  %v743_v28 = vld [vmem:[%s3314_s27 + $0x78] sm:$0xff]  ;;  %v774_v20 = vld [vmem:[%s3322_s25] sm:$0xff]  ;;  %728 = vst [vmem:[#allocation2 + $0x5ac] sm:$0xff] %v780_v59 }
  0x71   : > { %v777_v7 = vld [vmem:[%s3322_s25 + $0x20] sm:$0xff]  ;;  %731 = vst [vmem:[#allocation2 + $0x5ec] sm:$0xff] %v783_v55  ;;  %594 = vst [vmem:[#allocation2 + $0x3b4] sm:$0xff] %v780_v59  ;;  %v3575_v29 = vcombine.low %v738_v17, %v743_v28  ;;  %v679_v6 = vld [vmem:[%s3314_s27 + $0xbc] sm:$0xf]  ;;  %2164 = vmatpush1.bf16.msra.mxu0 %v2748_v25  ;;  %v2732_v59 = vcombine.low %v3387_v30, %v3390_v31  ;;  %2205 = vmatpush1.bf16.msra.mxu1 %v3359_v18 }
  0x72   : > { %4016 = vst [vmem:[#allocation18_spill] sm:$0xff] %v3560_v60  ;;  %4017 = vst [vmem:[#allocation19_spill] sm:$0xff] %v3566_v3  ;;  %v3577_v60 = vcombine.high %v738_v17, %v743_v28  ;;  %v3579_v10 = vcombine.low %v774_v20, %v777_v7  ;;  %v3581_v24 = vcombine.high %v774_v20, %v777_v7  ;;  %v667_v3 = vld [vmem:[%s3314_s27 + $0x3c] sm:$0xf]  ;;  %2165 = vmatprep.subr.bf16.mxu0 %v2733_v26  ;;  %v456_v26 = vld [vmem:[%s3322_s25 + $0x40] sm:$0xf] }
  0x73   : > { %4018 = vst [vmem:[#allocation20_spill] sm:$0xff] %v3568_v5  ;;  %596 = vst [vmem:[#allocation2 + $0x3f4] sm:$0xff] %v783_v55  ;;  %v685_v5 = vld [vmem:[%s3314_s27 + $0xfc] sm:$0xf]  ;;  %v2717_v17 = vcombine.high %v3393_v32, %v3396_v33  ;;  %2206 = vmatprep.subr.bf16.mxu1 %v3368_v23  ;;  %v2716_v30 = vcombine.low %v3393_v32, %v3396_v33  ;;  %v3598_v18 = vcombine.high %v3402_v35, %v3405_v36 }
  0x74   : > { %722 = vst [vmem:[#allocation2 + $0x52c] sm:$0xff] %v774_v20  ;;  %725 = vst [vmem:[#allocation2 + $0x56c] sm:$0xff] %v777_v7  ;;  %v673_v55 = vld [vmem:[%s3314_s27 + $0x7c] sm:$0xf]  ;;  %v3603_v31 = vcombine.high %v3408_v37, %v3417_v40  ;;  %v3607_v23 = vcombine.low %v3402_v35, %v3405_v36  ;;  %v3613_v32 = vcombine.low %v3408_v37, %v3417_v40  ;;  %v589_v36 = vld [vmem:[%s3322_s25 + $0x68] sm:$0xf] }
  0x75   : > { %590 = vst [vmem:[#allocation2 + $0x334] sm:$0xff] %v774_v20  ;;  %592 = vst [vmem:[#allocation2 + $0x374] sm:$0xff] %v777_v7  ;;  %2166 = vmatpush1.bf16.msra.mxu0 %v2732_v59  ;;  %2207 = vmatpush1.bf16.msra.mxu1 %v3399_v34  ;;  %v3617_v33 = vcombine.high %v3420_v41, %v3423_v42  ;;  %v546_v34 = vld [vmem:[%s3314_s27 + $0xbc] sm:$0xf]  ;;  %v587_v20 = vld [vmem:[%s3322_s25 + $0x48] sm:$0xf]  ;;  %v3625_v35 = vcombine.high %v3429_v44, %v3432_v45 }
  0x76   : > { %703 = vst [vmem:[#allocation2 + $0x5a8] sm:$0xf] %v679_v6  ;;  %709 = vst [vmem:[#allocation2 + $0x5e8] sm:$0xf] %v685_v5  ;;  %2167 = vmatprep.subr.bf16.mxu0 %v2717_v17  ;;  %2208 = vmatprep.subr.bf16.mxu1 %v3414_v39  ;;  %v553_v39 = vld [vmem:[%s3314_s27 + $0xfc] sm:$0xf]  ;;  %v3631_v37 = vcombine.low %v3420_v41, %v3423_v42  ;;  %v3637_v40 = vcombine.low %v3429_v44, %v3432_v45 }
  0x77   : > { %691 = vst [vmem:[#allocation2 + $0x528] sm:$0xf] %v667_v3  ;;  %697 = vst [vmem:[#allocation2 + $0x568] sm:$0xf] %v673_v55  ;;  %v539_v7 = vld [vmem:[%s3314_s27 + $0x7c] sm:$0xf]  ;;  %v3645_v25 = vcombine.high %v3435_v46, %v3438_v47  ;;  %v3653_v42 = vcombine.low %v3435_v46, %v3438_v47  ;;  %v3658_v44 = vcombine.high %v3441_v48, %v3444_v49 }
  0x78   : > { %574 = vst [vmem:[#allocation2 + $0x3b0] sm:$0xf] %v546_v34  ;;  %581 = vst [vmem:[#allocation2 + $0x3f0] sm:$0xf] %v553_v39  ;;  %v583_v3 = vld [vmem:[%s3322_s25 + $0x8] sm:$0xf]  ;;  %v3665_v45 = vcombine.low %v3441_v48, %v3444_v49  ;;  %v3685_v6 = vcombine.high %v3452_v52, %v3455_v53  ;;  %v3690_v55 = vcombine.low %v3449_v51, %v3449_v51 }
  0x79   : > { %2168 = vmatpush1.bf16.msra.mxu0 %v2716_v30  ;;  %2209 = vmatpush1.bf16.msra.mxu1 %v3447_v50  ;;  %595 = vst [vmem:[#allocation2 + $0x3bc] sm:$0xf] %v587_v20  ;;  %597 = vst [vmem:[#allocation2 + $0x3fc] sm:$0xf] %v589_v36  ;;  %v532_v50 = vld [vmem:[%s3314_s27 + $0x3c] sm:$0xf]  ;;  %v3697_v17 = vcombine.low %v3452_v52, %v3455_v53  ;;  %v3702_v30 = vcombine.high %v3468_v57, %v3471_v58 }
  0x7a   : > { %2173 = vmatprep.subr.bf16.mxu0 %v3598_v18  ;;  %2214 = vmatprep.subr.bf16.mxu1 %v3603_v31  ;;  %560 = vst [vmem:[#allocation2 + $0x330] sm:$0xf] %v532_v50  ;;  %567 = vst [vmem:[#allocation2 + $0x370] sm:$0xf] %v539_v7  ;;  %v585_v41 = vld [vmem:[%s3322_s25 + $0x28] sm:$0xf]  ;;  %v3711_v51 = vcombine.low %v3468_v57, %v3471_v58 }
  0x7b   : > { %591 = vst [vmem:[#allocation2 + $0x33c] sm:$0xf] %v583_v3  ;;  %593 = vst [vmem:[#allocation2 + $0x37c] sm:$0xf] %v585_v41  ;;  %v413_v46 = vld [vmem:[%s3314_s27 + $0xbc] sm:$0xf] }
  0x7c   : > { %v421_v47 = vld [vmem:[%s3314_s27 + $0xfc] sm:$0xf]  ;;  %445 = vst [vmem:[#allocation2 + $0x1b8] sm:$0xf] %v413_v46  ;;  %v457_v48 = vld [vmem:[%s3322_s25 + $0x60] sm:$0xf] }
  0x7d   : > { %2174 = vmatpush2.bf16.msra.mxu0 %v3607_v23  ;;  %2215 = vmatpush2.bf16.msra.mxu1 %v3613_v32  ;;  %453 = vst [vmem:[#allocation2 + $0x1f8] sm:$0xf] %v421_v47  ;;  %460 = vst [vmem:[#allocation2 + $0x1bc] sm:$0xf] %v456_v26  ;;  %v397_v49 = vld [vmem:[%s3314_s27 + $0x3c] sm:$0xf] }
  0x7e   : > { %2175 = vmatprep.subr.bf16.mxu0 %v3617_v33  ;;  %2216 = vmatprep.subr.bf16.mxu1 %v3625_v35  ;;  %461 = vst [vmem:[#allocation2 + $0x1fc] sm:$0xf] %v457_v48  ;;  %v405_v28 = vld [vmem:[%s3314_s27 + $0x7c] sm:$0xf]  ;;  %v454_v5 = vld [vmem:[%s3322_s25] sm:$0xf] }
  0x7f   : > { %429 = vst [vmem:[#allocation2 + $0x138] sm:$0xf] %v397_v49  ;;  %437 = vst [vmem:[#allocation2 + $0x178] sm:$0xf] %v405_v28  ;;  %v455_v59 = vld [vmem:[%s3322_s25 + $0x20] sm:$0xf] }
  0x80   : > { %458 = vst [vmem:[#allocation2 + $0x13c] sm:$0xf] %v454_v5  ;;  %459 = vst [vmem:[#allocation2 + $0x17c] sm:$0xf] %v455_v59  ;;  %v3722_v52 = vld [vmem:[%s3314_s27 + $0xb0] sm:$0xff]  ;;  %v781_v50 = vld [vmem:[%s3322_s25 + $0x48] sm:$0xff] }
  0x81   : > { %2176 = vmatpush2.bf16.msra.mxu0 %v3631_v37  ;;  %2217 = vmatpush2.bf16.msra.mxu1 %v3637_v40  ;;  %v3725_v53 = vld [vmem:[%s3314_s27 + $0xf0] sm:$0xff]  ;;  %v784_v7 = vld [vmem:[%s3322_s25 + $0x68] sm:$0xff]  ;;  %729 = vst [vmem:[#allocation2 + $0x5b4] sm:$0xff] %v781_v50 }
  0x82   : > { %2177 = vmatprep.subr.bf16.mxu0 %v3342_v8  ;;  %2218 = vmatprep.subr.bf16.mxu1 %v3645_v25  ;;  %v2744_v57 = vcombine.low %v3722_v52, %v3725_v53  ;;  %v2745_v58 = vcombine.high %v3722_v52, %v3725_v53  ;;  %v3736_v34 = vld [vmem:[%s3314_s27 + $0x30] sm:$0xff]  ;;  %v3755_v41 = vcombine.low %v781_v50, %v784_v7  ;;  %v775_v49 = vld [vmem:[%s3322_s25 + $0x8] sm:$0xff] }
  0x83   : > { %v3739_v39 = vld [vmem:[%s3314_s27 + $0x70] sm:$0xff]  ;;  %v3757_v46 = vcombine.high %v781_v50, %v784_v7  ;;  %732 = vst [vmem:[#allocation2 + $0x5f4] sm:$0xff] %v784_v7  ;;  %v778_v28 = vld [vmem:[%s3322_s25 + $0x28] sm:$0xff]  ;;  %723 = vst [vmem:[#allocation2 + $0x534] sm:$0xff] %v775_v49 }
  0x84   : > { %v2728_v20 = vcombine.low %v3736_v34, %v3739_v39  ;;  %v2729_v36 = vcombine.high %v3736_v34, %v3739_v39  ;;  %v3752_v3 = vld [vmem:[%s3322_s25 + $0x50] sm:$0xff]  ;;  %v3777_v59 = vcombine.low %v775_v49, %v778_v28  ;;  %v3779_v50 = vcombine.high %v775_v49, %v778_v28  ;;  %726 = vst [vmem:[#allocation2 + $0x574] sm:$0xff] %v778_v28  ;;  %v902_v28 = vld [vmem:[#allocation2 + $0x338] sm:$0xff] }
  0x85   : > { %2178 = vmatpush2.bf16.msra.mxu0 %v3344_v9  ;;  %2219 = vmatpush2.bf16.msra.mxu1 %v3653_v42  ;;  %v3760_v47 = vld [vmem:[%s3322_s25 + $0x70] sm:$0xff] }
  0x86   : > { %2179 = vmatprep.subr.bf16.mxu0 %v3352_v14  ;;  %2220 = vmatprep.subr.bf16.mxu1 %v3658_v44  ;;  %v718_v26 = vld [vmem:[%s3322_s25 + $0x50] sm:$0xf]  ;;  %v2938_v48 = vcombine.low %v3752_v3, %v3760_v47 }
  0x87   : > { %730 = vst [vmem:[#allocation2 + $0x5bc] sm:$0xf] %v718_v26  ;;  %v3774_v5 = vld [vmem:[%s3322_s25 + $0x10] sm:$0xff] }
  0x88   : > { %v3782_v7 = vld [vmem:[%s3322_s25 + $0x30] sm:$0xff] }
  0x89   : > { %2180 = vmatpush2.bf16.msra.mxu0 %v3366_v22  ;;  %2221 = vmatpush2.bf16.msra.mxu1 %v3665_v45  ;;  %v712_v26 = vld [vmem:[%s3322_s25 + $0x10] sm:$0xf] }
  0x8a   : > { %2181 = vmatprep.subr.bf16.mxu0 %v3378_v27  ;;  %2222 = vmatprep.subr.bf16.mxu1 %v3598_v18  ;;  %724 = vst [vmem:[#allocation2 + $0x53c] sm:$0xf] %v712_v26  ;;  %v909_v49 = vld [vmem:[#allocation2 + $0x370] sm:$0xff] }
  0x8b   : > { %v989_v52 = vld [vmem:[#allocation2 + $0x5f0] sm:$0xff] }
  0x8c   : > { %v973_v34 = vld [vmem:[#allocation2 + $0x570] sm:$0xff] }
  0x8d   : > { %2182 = vmatpush2.bf16.msra.mxu0 %v3412_v38  ;;  %2223 = vmatpush2.bf16.msra.mxu1 %v3607_v23 }
  0x8e   : > { %2183 = vmatprep.subr.bf16.mxu0 %v3426_v43  ;;  %2224 = vmatprep.subr.bf16.mxu1 %v3617_v33  ;;  %v982_v53 = vld [vmem:[#allocation2 + $0x5b8] sm:$0xff] }
  0x91   : > { %2184 = vmatpush2.bf16.msra.mxu0 %v3459_v54  ;;  %2225 = vmatpush2.bf16.msra.mxu1 %v3631_v37  ;;  %v966_v39 = vld [vmem:[#allocation2 + $0x538] sm:$0xff] }
  0x92   : > { %2235 = vmatprep.subr.bf16.mxu0 %v3645_v25  ;;  %2276 = vmatprep.subr.bf16.mxu1 %v3685_v6 }
  0x94   : > { %2186 = vmatmul.mubr.bf16.vlgmr.msra.gmra.mxu0 %v3690_v55  ;;  %2227 = vmatmul.mubr.bf16.vlgmr.msra.gmra.mxu1 %v3690_v55 }
  0x95   : > { %2236 = vmatpush1.bf16.msra.mxu0 %v3653_v42  ;;  %2277 = vmatpush1.bf16.msra.mxu1 %v3697_v17 }
  0x96   : > { %2237 = vmatprep.subr.bf16.mxu0 %v3658_v44  ;;  %2278 = vmatprep.subr.bf16.mxu1 %v3702_v30 }
  0x97   : > { %2942 = vmatprep.mubr.msk.bf16.mxu0 %vm2149_vm0, %v3465_v56  ;;  %2943 = vmatprep.mubr.msk.bf16.mxu1 %vm2149_vm0, %v3465_v56 }
  0x99   : > { %2238 = vmatpush1.bf16.msra.mxu0 %v3665_v45  ;;  %2279 = vmatpush1.bf16.msra.mxu1 %v3711_v51 }
  0x9a   : > { %2239 = vmatprep.subr.bf16.mxu0 %v3598_v18  ;;  %2280 = vmatprep.subr.bf16.mxu1 %v3603_v31 }
  0x9d   : > { %2240 = vmatpush1.bf16.msra.mxu0 %v3607_v23  ;;  %2281 = vmatpush1.bf16.msra.mxu1 %v3613_v32 }
  0x9e   : > { %2241 = vmatprep.subr.bf16.mxu0 %v3617_v33  ;;  %2282 = vmatprep.subr.bf16.mxu1 %v3625_v35 }
  0xa1   : > { %2242 = vmatpush1.bf16.msra.mxu0 %v3631_v37  ;;  %2283 = vmatpush1.bf16.msra.mxu1 %v3637_v40 }
  0xa2   : > { %2243 = vmatprep.subr.bf16.mxu0 %v3342_v8  ;;  %2284 = vmatprep.subr.bf16.mxu1 %v3645_v25  ;;  %v721_v8 = vld [vmem:[%s3322_s25 + $0x70] sm:$0xf]  ;;  %v2939_v25 = vcombine.high %v3752_v3, %v3760_v47 }
  0xa3   : > { %733 = vst [vmem:[#allocation2 + $0x5fc] sm:$0xf] %v721_v8  ;;  %v901_v8 = vld [vmem:[#allocation2 + $0x330] sm:$0xff] }
  0xa5   : > { %2244 = vmatpush1.bf16.msra.mxu0 %v3344_v9  ;;  %2285 = vmatpush1.bf16.msra.mxu1 %v3653_v42  ;;  %v715_v9 = vld [vmem:[%s3322_s25 + $0x30] sm:$0xf]  ;;  %v2922_v42 = vcombine.low %v3774_v5, %v3782_v7 }
  0xa6   : > { %2245 = vmatprep.subr.bf16.mxu0 %v3352_v14  ;;  %2286 = vmatprep.subr.bf16.mxu1 %v3658_v44  ;;  %v2923_v14 = vcombine.high %v3774_v5, %v3782_v7  ;;  %727 = vst [vmem:[#allocation2 + $0x57c] sm:$0xf] %v715_v9  ;;  %v917_v44 = vld [vmem:[#allocation2 + $0x3b0] sm:$0xff] }
  0xa9   : > { %2246 = vmatpush1.bf16.msra.mxu0 %v3366_v22  ;;  %2287 = vmatpush1.bf16.msra.mxu1 %v3665_v45  ;;  %v4019_v22 = vld [vmem:[#allocation11_spill] sm:$0xff]  ;;  %v925_v45 = vld [vmem:[#allocation2 + $0x3f0] sm:$0xff] }
  0xaa   : > { %2247 = vmatprep.subr.bf16.mxu0 %v3378_v27  ;;  %2288 = vmatprep.subr.bf16.mxu1 %v3598_v18  ;;  %v4020_v27 = vld [vmem:[#allocation12_spill] sm:$0xff]  ;;  %v2840_v26 = vcombine.low %v917_v44, %v925_v45 }
  0xab   : > { %v4024_v18 = vld [vmem:[#allocation16_spill] sm:$0xff] }
  0xad   : > { %2248 = vmatpush1.bf16.msra.mxu0 %v3412_v38  ;;  %2289 = vmatpush1.bf16.msra.mxu1 %v3607_v23  ;;  %v4021_v38 = vld [vmem:[#allocation13_spill] sm:$0xff] }
  0xae   : > { %2249 = vmatprep.subr.bf16.mxu0 %v3426_v43  ;;  %2290 = vmatprep.subr.bf16.mxu1 %v3617_v33  ;;  %v4022_v43 = vld [vmem:[#allocation15_spill] sm:$0xff] }
  0xaf   : > { %v988_v33 = vld [vmem:[#allocation2 + $0x5e8] sm:$0xff] }
  0xb1   : > { %2250 = vmatpush1.bf16.msra.mxu0 %v3459_v54  ;;  %2291 = vmatpush1.bf16.msra.mxu1 %v3631_v37  ;;  %v4023_v54 = vld [vmem:[#allocation14_spill] sm:$0xff]  ;;  %v964_v37 = vld [vmem:[#allocation2 + $0x528] sm:$0xff] }
  0xb2   : > { %2255 = vmatprep.subr.bf16.mxu0 %v3486_v1  ;;  %2296 = vmatprep.subr.bf16.mxu1 %v3496_v12 }
  0xb5   : > { %2256 = vmatpush2.bf16.msra.mxu0 %v3484_v0  ;;  %2297 = vmatpush2.bf16.msra.mxu1 %v3488_v2 }
  0xb6   : > { %2257 = vmatprep.subr.bf16.mxu0 %v3500_v15  ;;  %2298 = vmatprep.subr.bf16.mxu1 %v3508_v21 }
  0xb9   : > { %2258 = vmatpush2.bf16.msra.mxu0 %v3498_v13  ;;  %2299 = vmatpush2.bf16.msra.mxu1 %v4019_v22 }
  0xba   : > { %2259 = vmatprep.subr.bf16.mxu0 %v3685_v6  ;;  %2300 = vmatprep.subr.bf16.mxu1 %v3516_v61 }
  0xbd   : > { %2260 = vmatpush2.bf16.msra.mxu0 %v3697_v17  ;;  %2301 = vmatpush2.bf16.msra.mxu1 %v4020_v27 }
  0xbe   : > { %2261 = vmatprep.subr.bf16.mxu0 %v3702_v30  ;;  %2302 = vmatprep.subr.bf16.mxu1 %v3520_v63 }
  0xc1   : > { %2262 = vmatpush2.bf16.msra.mxu0 %v3711_v51  ;;  %2303 = vmatpush2.bf16.msra.mxu1 %v3518_v62 }
  0xc2   : > { %2263 = vmatprep.subr.bf16.mxu0 %v3603_v31  ;;  %2304 = vmatprep.subr.bf16.mxu1 %v3486_v1  ;;  %v4025_v31 = vld [vmem:[#allocation17_spill] sm:$0xff] }
  0xc3   : > { %v4026_v23 = vcombine.high %v4024_v18, %v4025_v31 }
  0xc5   : > { %2264 = vmatpush2.bf16.msra.mxu0 %v3613_v32  ;;  %2305 = vmatpush2.bf16.msra.mxu1 %v3484_v0  ;;  %v4028_v32 = vcombine.high %v3540_v19, %v3551_v4 }
  0xc6   : > { %2265 = vmatprep.subr.bf16.mxu0 %v3625_v35  ;;  %2306 = vmatprep.subr.bf16.mxu1 %v3500_v15  ;;  %v4031_v35 = vld [vmem:[#allocation18_spill] sm:$0xff] }
  0xc9   : > { %2266 = vmatpush2.bf16.msra.mxu0 %v3637_v40  ;;  %2307 = vmatpush2.bf16.msra.mxu1 %v3498_v13 }
  0xca   : > { %2317 = vmatprep.subr.bf16.mxu0 %v3516_v61  ;;  %2358 = vmatprep.subr.bf16.mxu1 %v3527_v16 }
  0xcc   : > { %2268 = vmatmul.mubr.bf16.vlgmr.msra.gmra.mxu0 %v3690_v55  ;;  %2309 = vmatmul.mubr.bf16.vlgmr.msra.gmra.mxu1 %v3690_v55 }
  0xcd   : > { %2318 = vmatpush1.bf16.msra.mxu0 %v4020_v27  ;;  %2359 = vmatpush1.bf16.msra.mxu1 %v4021_v38 }
  0xce   : > { %2319 = vmatprep.subr.bf16.mxu0 %v3520_v63  ;;  %2360 = vmatprep.subr.bf16.mxu1 %v4022_v43 }
  0xcf   : > { %2944 = vmatprep.mubr.msk.bf16.mxu0 %vm2149_vm0, %v3465_v56  ;;  %2945 = vmatprep.mubr.msk.bf16.mxu1 %vm2149_vm0, %v3465_v56 }
  0xd1   : > { %2320 = vmatpush1.bf16.msra.mxu0 %v3518_v62  ;;  %2361 = vmatpush1.bf16.msra.mxu1 %v4023_v54 }
  0xd2   : > { %2321 = vmatprep.subr.bf16.mxu0 %v3486_v1  ;;  %2362 = vmatprep.subr.bf16.mxu1 %v3496_v12 }
  0xd5   : > { %2322 = vmatpush1.bf16.msra.mxu0 %v3484_v0  ;;  %2363 = vmatpush1.bf16.msra.mxu1 %v3488_v2 }
  0xd6   : > { %2323 = vmatprep.subr.bf16.mxu0 %v3500_v15  ;;  %2364 = vmatprep.subr.bf16.mxu1 %v3508_v21 }
  0xd9   : > { %2324 = vmatpush1.bf16.msra.mxu0 %v3498_v13  ;;  %2365 = vmatpush1.bf16.msra.mxu1 %v4019_v22 }
  0xda   : > { %2325 = vmatprep.subr.bf16.mxu0 %v3685_v6  ;;  %2366 = vmatprep.subr.bf16.mxu1 %v3516_v61  ;;  %v4027_v61 = vcombine.low %v4024_v18, %v4025_v31  ;;  %v918_v6 = vld [vmem:[#allocation2 + $0x3b8] sm:$0xff] }
  0xdb   : > { %v862_v31 = vld [vmem:[#allocation2 + $0x1f8] sm:$0xff] }
  0xdd   : > { %2326 = vmatpush1.bf16.msra.mxu0 %v3697_v17  ;;  %2367 = vmatpush1.bf16.msra.mxu1 %v4020_v27  ;;  %v926_v17 = vld [vmem:[#allocation2 + $0x3f8] sm:$0xff] }
  0xde   : > { %2327 = vmatprep.subr.bf16.mxu0 %v3702_v30  ;;  %2368 = vmatprep.subr.bf16.mxu1 %v3520_v63  ;;  %v4030_v63 = vld [vmem:[#allocation19_spill] sm:$0xff]  ;;  %v2841_v30 = vcombine.high %v917_v44, %v925_v45  ;;  %v2842_v9 = vcombine.low %v918_v6, %v926_v17 }
  0xe1   : > { %2328 = vmatpush1.bf16.msra.mxu0 %v3711_v51  ;;  %2369 = vmatpush1.bf16.msra.mxu1 %v3518_v62  ;;  %v4029_v62 = vcombine.low %v3540_v19, %v3551_v4  ;;  %v972_v19 = vld [vmem:[#allocation2 + $0x568] sm:$0xff]  ;;  %v2843_v51 = vcombine.high %v918_v6, %v926_v17 }
  0xe2   : > { %2329 = vmatprep.subr.bf16.mxu0 %v4026_v23  ;;  %2370 = vmatprep.subr.bf16.mxu1 %v3486_v1  ;;  %v980_v1 = vld [vmem:[#allocation2 + $0x5a8] sm:$0xff]  ;;  %v2887_v4 = vcombine.high %v964_v37, %v972_v19  ;;  %v2886_v40 = vcombine.low %v964_v37, %v972_v19 }
  0xe5   : > { %2330 = vmatpush1.bf16.msra.mxu0 %v4027_v61  ;;  %2371 = vmatpush1.bf16.msra.mxu1 %v3484_v0  ;;  %v4032_v0 = vld [vmem:[#allocation20_spill] sm:$0xff]  ;;  %v838_v61 = vld [vmem:[#allocation2 + $0x138] sm:$0xff] }
  0xe6   : > { %2331 = vmatprep.subr.bf16.mxu0 %v4028_v32  ;;  %2372 = vmatprep.subr.bf16.mxu1 %v3500_v15  ;;  %v2903_v15 = vcombine.high %v980_v1, %v988_v33  ;;  %v846_v32 = vld [vmem:[#allocation2 + $0x178] sm:$0xff] }
  0xe9   : > { %2332 = vmatpush1.bf16.msra.mxu0 %v4029_v62  ;;  %2373 = vmatpush1.bf16.msra.mxu1 %v3498_v13  ;;  %v2902_v13 = vcombine.low %v980_v1, %v988_v33  ;;  %v2763_v62 = vcombine.high %v838_v61, %v846_v32  ;;  %v2762_v1 = vcombine.low %v838_v61, %v846_v32 }
  0xea   : > { %2337 = vmatprep.subr.bf16.mxu0 %v4030_v63  ;;  %2378 = vmatprep.subr.bf16.mxu1 %v3570_v11 }
  0xed   : > { %2338 = vmatpush2.bf16.msra.mxu0 %v4031_v35  ;;  %2379 = vmatpush2.bf16.msra.mxu1 %v4032_v0 }
  0xee   : > { %2339 = vmatprep.subr.bf16.mxu0 %v3577_v60  ;;  %2380 = vmatprep.subr.bf16.mxu1 %v3581_v24 }
  0xf1   : > { %2340 = vmatpush2.bf16.msra.mxu0 %v3575_v29  ;;  %2381 = vmatpush2.bf16.msra.mxu1 %v3579_v10 }
  0xf2   : > { %2341 = vmatprep.subr.bf16.mxu0 %v3527_v16  ;;  %2382 = vmatprep.subr.bf16.mxu1 %v2903_v15 }
  0xf5   : > { %2342 = vmatpush2.bf16.msra.mxu0 %v4021_v38  ;;  %2383 = vmatpush2.bf16.msra.mxu1 %v2902_v13 }
  0xf6   : > { %2343 = vmatprep.subr.bf16.mxu0 %v4022_v43  ;;  %2384 = vmatprep.subr.bf16.mxu1 %v2887_v4 }
  0xf9   : > { %2344 = vmatpush2.bf16.msra.mxu0 %v4023_v54  ;;  %2385 = vmatpush2.bf16.msra.mxu1 %v2886_v40 }
  0xfa   : > { %2345 = vmatprep.subr.bf16.mxu0 %v3496_v12  ;;  %2386 = vmatprep.subr.bf16.mxu1 %v4030_v63  ;;  %v910_v12 = vld [vmem:[#allocation2 + $0x378] sm:$0xff] }
  0xfb   : > { %v2827_v27 = vcombine.high %v902_v28, %v910_v12  ;;  %v2826_v18 = vcombine.low %v902_v28, %v910_v12 }
  0xfd   : > { %2346 = vmatpush2.bf16.msra.mxu0 %v3488_v2  ;;  %2387 = vmatpush2.bf16.msra.mxu1 %v4031_v35  ;;  %v2825_v2 = vcombine.high %v901_v8, %v909_v49 }
  0xfe   : > { %2347 = vmatprep.subr.bf16.mxu0 %v3508_v21  ;;  %2388 = vmatprep.subr.bf16.mxu1 %v3577_v60  ;;  %v2824_v21 = vcombine.low %v901_v8, %v909_v49 }
 0x101   : > { %2348 = vmatpush2.bf16.msra.mxu0 %v4019_v22  ;;  %2389 = vmatpush2.bf16.msra.mxu1 %v3575_v29  ;;  %v854_v22 = vld [vmem:[#allocation2 + $0x1b8] sm:$0xff] }
 0x102   : > { %2399 = vmatprep.subr.bf16.mxu0 %v2841_v30  ;;  %2440 = vmatprep.subr.bf16.mxu1 %v2843_v51  ;;  %v2779_v23 = vcombine.high %v854_v22, %v862_v31 }
 0x104   : > { %2350 = vmatmul.mubr.bf16.vlgmr.msra.gmra.mxu0 %v3690_v55  ;;  %2391 = vmatmul.mubr.bf16.vlgmr.msra.gmra.mxu1 %v3690_v55 }
 0x105   : > { %2400 = vmatpush1.bf16.msra.mxu0 %v2840_v26  ;;  %2441 = vmatpush1.bf16.msra.mxu1 %v2842_v9 }
 0x106   : > { %2401 = vmatprep.subr.bf16.mxu0 %v2825_v2  ;;  %2442 = vmatprep.subr.bf16.mxu1 %v2827_v27 }
 0x107   : > { %2946 = vmatprep.mubr.msk.bf16.mxu0 %vm2149_vm0, %v3465_v56  ;;  %2947 = vmatprep.mubr.msk.bf16.mxu1 %vm2149_vm0, %v3465_v56  ;;  %v2778_v56 = vcombine.low %v854_v22, %v862_v31 }
 0x109   : > { %2402 = vmatpush1.bf16.msra.mxu0 %v2824_v21  ;;  %2443 = vmatpush1.bf16.msra.mxu1 %v2826_v18 }
 0x10a   : > { %2403 = vmatprep.subr.bf16.mxu0 %v4030_v63  ;;  %2444 = vmatprep.subr.bf16.mxu1 %v3570_v11 }
 0x10d   : > { %2404 = vmatpush1.bf16.msra.mxu0 %v4031_v35  ;;  %2445 = vmatpush1.bf16.msra.mxu1 %v4032_v0 }
 0x10e   : > { %2405 = vmatprep.subr.bf16.mxu0 %v3577_v60  ;;  %2446 = vmatprep.subr.bf16.mxu1 %v3581_v24 }
 0x111   : > { %2406 = vmatpush1.bf16.msra.mxu0 %v3575_v29  ;;  %2447 = vmatpush1.bf16.msra.mxu1 %v3579_v10 }
 0x112   : > { %2407 = vmatprep.subr.bf16.mxu0 %v3527_v16  ;;  %2448 = vmatprep.subr.bf16.mxu1 %v2779_v23  ;;  %v981_v16 = vld [vmem:[#allocation2 + $0x5b0] sm:$0xff] }
 0x115   : > { %2408 = vmatpush1.bf16.msra.mxu0 %v4021_v38  ;;  %2449 = vmatpush1.bf16.msra.mxu1 %v2778_v56 }
 0x116   : > { %2409 = vmatprep.subr.bf16.mxu0 %v4022_v43  ;;  %2450 = vmatprep.subr.bf16.mxu1 %v2763_v62 }
 0x119   : > { %2410 = vmatpush1.bf16.msra.mxu0 %v4023_v54  ;;  %2451 = vmatpush1.bf16.msra.mxu1 %v2762_v1 }
 0x11a   : > { %2411 = vmatprep.subr.bf16.mxu0 %v2745_v58  ;;  %2452 = vmatprep.subr.bf16.mxu1 %v4030_v63  ;;  %v965_v58 = vld [vmem:[#allocation2 + $0x530] sm:$0xff] }
 0x11b   : > { %v2889_v47 = vcombine.high %v965_v58, %v973_v34 }
 0x11d   : > { %2412 = vmatpush1.bf16.msra.mxu0 %v2744_v57  ;;  %2453 = vmatpush1.bf16.msra.mxu1 %v4031_v35  ;;  %v990_v57 = vld [vmem:[#allocation2 + $0x5f8] sm:$0xff] }
 0x11e   : > { %2413 = vmatprep.subr.bf16.mxu0 %v2729_v36  ;;  %2454 = vmatprep.subr.bf16.mxu1 %v3577_v60  ;;  %v2905_v60 = vcombine.high %v981_v16, %v989_v52  ;;  %v2904_v36 = vcombine.low %v981_v16, %v989_v52  ;;  %v2906_v3 = vcombine.low %v982_v53, %v990_v57 }
 0x121   : > { %2414 = vmatpush1.bf16.msra.mxu0 %v2728_v20  ;;  %2455 = vmatpush1.bf16.msra.mxu1 %v3575_v29  ;;  %v2907_v29 = vcombine.high %v982_v53, %v990_v57  ;;  %v974_v20 = vld [vmem:[#allocation2 + $0x578] sm:$0xff] }
 0x122   : > { %2419 = vmatprep.subr.bf16.mxu0 %v3757_v46  ;;  %2460 = vmatprep.subr.bf16.mxu1 %v2939_v25  ;;  %v2888_v25 = vcombine.low %v965_v58, %v973_v34 }
 0x125   : > { %2420 = vmatpush2.bf16.msra.mxu0 %v3755_v41  ;;  %2461 = vmatpush2.bf16.msra.mxu1 %v2938_v48  ;;  %v2891_v48 = vcombine.high %v966_v39, %v974_v20 }
 0x126   : > { %2421 = vmatprep.subr.bf16.mxu0 %v3779_v50  ;;  %2462 = vmatprep.subr.bf16.mxu1 %v2923_v14  ;;  %v2890_v14 = vcombine.low %v966_v39, %v974_v20 }
 0x129   : > { %2422 = vmatpush2.bf16.msra.mxu0 %v3777_v59  ;;  %2463 = vmatpush2.bf16.msra.mxu1 %v2922_v42 }
 0x12a   : > { %2423 = vmatprep.subr.bf16.mxu0 %v2905_v60  ;;  %2464 = vmatprep.subr.bf16.mxu1 %v2907_v29 }
 0x12d   : > { %2424 = vmatpush2.bf16.msra.mxu0 %v2904_v36  ;;  %2465 = vmatpush2.bf16.msra.mxu1 %v2906_v3 }
 0x12e   : > { %2425 = vmatprep.subr.bf16.mxu0 %v2889_v47  ;;  %2466 = vmatprep.subr.bf16.mxu1 %v2891_v48 }
 0x131   : > { %2426 = vmatpush2.bf16.msra.mxu0 %v2888_v25  ;;  %2467 = vmatpush2.bf16.msra.mxu1 %v2890_v14 }
 0x132   : > { %2427 = vmatprep.subr.bf16.mxu0 %v3570_v11  ;;  %2468 = vmatprep.subr.bf16.mxu1 %v3757_v46 }
 0x135   : > { %2428 = vmatpush2.bf16.msra.mxu0 %v4032_v0  ;;  %2469 = vmatpush2.bf16.msra.mxu1 %v3755_v41 }
 0x136   : > { %2429 = vmatprep.subr.bf16.mxu0 %v3581_v24  ;;  %2470 = vmatprep.subr.bf16.mxu1 %v3779_v50 }
 0x139   : > { %2430 = vmatpush2.bf16.msra.mxu0 %v3579_v10  ;;  %2471 = vmatpush2.bf16.msra.mxu1 %v3777_v59 }
 0x13c   : > { %2432 = vmatmul.mubr.bf16.vlgmr.msra.gmra.mxu0 %v3690_v55  ;;  %2473 = vmatmul.mubr.bf16.vlgmr.msra.gmra.mxu1 %v3690_v55 }
 0x154   : > { %v2187_v5 = vpop.f32.mrf.mxu0  ;;  %v2228_v7 = vpop.f32.mrf.mxu1 }
 0x155   : > { %v2500_v11 = vmul.f32 %v2187_v5, %v2187_v5  ;;  %v2502_v42 = vmul.f32 %v2228_v7, %v2228_v7 }
 0x156   : > { %v2189_v46 = vpop.f32.mrf.mxu0  ;;  %v2230_v41 = vpop.f32.mrf.mxu1 }
 0x157   : > { %v2481_v38 = vadd.f32 %v2189_v46, %v2187_v5  ;;  %v2501_v43 = vmul.f32 %v2189_v46, %v2189_v46  ;;  %v2503_v50 = vmul.f32 %v2230_v41, %v2230_v41 }
 0x158   : > { %v2191_v54 = vpop.f32.mrf.mxu0  ;;  %v2232_v33 = vpop.f32.mrf.mxu1 }
 0x159   : > { %v2516_v24 = vadd.f32 %v2501_v43, %v2500_v11  ;;  %v2482_v63 = vadd.f32 %v2481_v38, %v2228_v7 }
 0x15a   : > { %v2192_v10 = vpop.f32.mrf.mxu0  ;;  %v2233_v0 = vpop.f32.mrf.mxu1 }
 0x15b   : > { %v2483_v35 = vadd.f32 %v2482_v63, %v2230_v41  ;;  %v2517_v59 = vadd.f32 %v2516_v24, %v2502_v42 }
 0x15d   : > { %v2518_v15 = vadd.f32 %v2517_v59, %v2503_v50 }
 0x18c   : > { %v2269_v37 = vpop.f32.mrf.mxu0  ;;  %v2310_v13 = vpop.f32.mrf.mxu1 }
 0x18d   : > { %v2484_v55 = vadd.f32 %v2483_v35, %v2269_v37  ;;  %v2504_v19 = vmul.f32 %v2269_v37, %v2269_v37  ;;  %v2506_v44 = vmul.f32 %v2310_v13, %v2310_v13 }
 0x18e   : > { %v2271_v4 = vpop.f32.mrf.mxu0  ;;  %v2312_v17 = vpop.f32.mrf.mxu1 }
 0x18f   : > { %v2519_v40 = vadd.f32 %v2518_v15, %v2504_v19  ;;  %v2485_v45 = vadd.f32 %v2484_v55, %v2271_v4  ;;  %v2505_v6 = vmul.f32 %v2271_v4, %v2271_v4  ;;  %v2507_v49 = vmul.f32 %v2312_v17, %v2312_v17 }
 0x190   : > { %v2273_v30 = vpop.f32.mrf.mxu0  ;;  %v2314_v28 = vpop.f32.mrf.mxu1 }
 0x191   : > { %v2520_v51 = vadd.f32 %v2519_v40, %v2505_v6  ;;  %v2486_v8 = vadd.f32 %v2485_v45, %v2310_v13 }
 0x192   : > { %v2274_v12 = vpop.f32.mrf.mxu0  ;;  %v2315_v2 = vpop.f32.mrf.mxu1 }
 0x193   : > { %v2487_v26 = vadd.f32 %v2486_v8, %v2312_v17  ;;  %v2521_v9 = vadd.f32 %v2520_v51, %v2506_v44 }
 0x195   : > { %v2522_v27 = vadd.f32 %v2521_v9, %v2507_v49 }
 0x1c4   : > { %v2351_v21 = vpop.f32.mrf.mxu0  ;;  %v2392_v18 = vpop.f32.mrf.mxu1 }
 0x1c5   : > { %v2508_v62 = vmul.f32 %v2351_v21, %v2351_v21  ;;  %v2488_v1 = vadd.f32 %v2487_v26, %v2351_v21  ;;  %v2510_v57 = vmul.f32 %v2392_v18, %v2392_v18 }
 0x1c6   : > { %v2353_v22 = vpop.f32.mrf.mxu0  ;;  %v2394_v31 = vpop.f32.mrf.mxu1 }
 0x1c7   : > { %v2523_v16 = vadd.f32 %v2522_v27, %v2508_v62  ;;  %v2509_v52 = vmul.f32 %v2353_v22, %v2353_v22  ;;  %v2489_v53 = vadd.f32 %v2488_v1, %v2353_v22  ;;  %v2511_v58 = vmul.f32 %v2394_v31, %v2394_v31 }
 0x1c8   : > { %v2355_v23 = vpop.f32.mrf.mxu0  ;;  %v2396_v61 = vpop.f32.mrf.mxu1 }
 0x1c9   : > { %v2524_v60 = vadd.f32 %v2523_v16, %v2509_v52  ;;  %v2490_v29 = vadd.f32 %v2489_v53, %v2392_v18 }
 0x1ca   : > { %v2356_v32 = vpop.f32.mrf.mxu0  ;;  %v2397_v56 = vpop.f32.mrf.mxu1 }
 0x1cb   : > { %v2525_v34 = vadd.f32 %v2524_v60, %v2510_v57  ;;  %v2491_v39 = vadd.f32 %v2490_v29, %v2394_v31 }
 0x1cd   : > { %v2526_v36 = vadd.f32 %v2525_v34, %v2511_v58 }
 0x1fc   : > { %v2433_v20 = vpop.f32.mrf.mxu0  ;;  %v2474_v48 = vpop.f32.mrf.mxu1 }
 0x1fd   : > { %v2492_v3 = vadd.f32 %v2491_v39, %v2433_v20  ;;  %v2512_v47 = vmul.f32 %v2433_v20, %v2433_v20  ;;  %v2514_v5 = vmul.f32 %v2474_v48, %v2474_v48 }
 0x1fe   : > { %v2435_v25 = vpop.f32.mrf.mxu0  ;;  %v2476_v46 = vpop.f32.mrf.mxu1 }
 0x1ff   : > { %v2527_v14 = vadd.f32 %v2526_v36, %v2512_v47  ;;  %v2493_v11 = vadd.f32 %v2492_v3, %v2435_v25  ;;  %v2513_v7 = vmul.f32 %v2435_v25, %v2435_v25  ;;  %v2515_v33 = vmul.f32 %v2476_v46, %v2476_v46 }
 0x200   : > { %v2437_v42 = vpop.f32.mrf.mxu0  ;;  %v2478_v43 = vpop.f32.mrf.mxu1 }
 0x201   : > { %v2528_v38 = vadd.f32 %v2527_v14, %v2513_v7  ;;  %v2494_v41 = vadd.f32 %v2493_v11, %v2474_v48 }
 0x202   : > { %v2438_v54 = vpop.f32.mrf.mxu0  ;;  %v2479_v24 = vpop.f32.mrf.mxu1 }
 0x203   : > { %v2495_v63 = vadd.f32 %v2494_v41, %v2476_v46  ;;  %v2529_v50 = vadd.f32 %v2528_v38, %v2514_v5 }
 0x205   : > { %2496 = vadd.xlane.f32.xlu0 %v2495_v63  ;;  %v2530_v10 = vadd.f32 %v2529_v50, %v2515_v33 }
 0x209   : > { %2531 = vadd.xlane.f32.xlu0 %v2530_v10 }
 0x28e   : > { %v2497_v35 = vpop.xlane.xlu0 %2496 }
 0x28f   : > { %2499 = vst.msk [vmem:[%s317_s9] sm:$0xff] %vm2498_vm1, %v2497_v35 }
 0x292   : > { %v2532_v59 = vpop.xlane.xlu0 %2531 }
 0x293   : > { %2533 = vst.msk [vmem:[%s324_s30] sm:$0xff] %vm2498_vm1, %v2532_v59 }
 0x294 PF: > { %s21_s20 = sadd.s32 1, %s3171_s20   ;;  %s4033_s15 = smov %s3155_s16 }
 0x295   : > { %p18_p12 = scmp.ge.s32.totalorder %s21_s20, 4   ;;  %s4034_s16 = smov %s3159_s17 }
 0x296   : > { %s4035_s17 = smov %s3291_s5  ;;  %s4036_s18 = smov %s3167_s19 }
 0x297   : > { %s4037_s19 = smov %s4039_s7  ;;  %20 = sbr.rel (!%p18_p12) target bundleno = 10 (0xa), region = 101 }
 0x29c   :  { %2579 = vsyncpa [#allocation4], 1 }
 0x29d   :  { %2581 = vsyncpa [#allocation4 + $0x1], 1 }
 0x29e   :  { %2582 = vsyncpa [#allocation6], 1 }
 0x29f   :  { %2584 = vsyncpa [#allocation6 + $0x1], 1 }

</bundles_post_ra>
